<compile_context>
chip_gen: v6e
topology: v6e:2x2x1
jax: 0.10.0
libtpu: 0.0.40
codegen_flags: <defaults>
</compile_context>

<pallas_src>
import functools

import jax
import jax.numpy as jnp
from jax import lax
from jax.experimental import pallas as pl
from jax.experimental.pallas import tpu as pltpu

_LANE = 128


def _round_up(x, m):
    return (x + m - 1) // m * m


def _resident_spec(block_shape):
    """BlockSpec for a grid-invariant (resident) input; single-buffered."""
    index_map = lambda i: (0,) * len(block_shape)
    try:
        return pl.BlockSpec(block_shape, index_map, pipeline_mode=pl.Buffered(1))
    except Exception:  # older jax without pipeline_mode / Buffered
        return pl.BlockSpec(block_shape, index_map)


def _vmem_limit_bytes():
    """Leave headroom under the device's physical VMEM (64 MiB on v7x)."""
    cap = 128 * 1024 * 1024
    try:
        cap = int(pltpu.get_tpu_info().vmem_capacity_bytes)
    except Exception:
        pass
    return min(int(cap * 0.85), 112 * 1024 * 1024)


def _quantizer_kernel(*refs, tile_n, n_valid, ragged, with_zst):
    if with_zst:
        t_ref, z_ref, et_ref, e_ref, esq_ref, zst_ref, idx_ref, loss_ref = refs
    else:
        z_ref, et_ref, esq_ref, idx_ref, loss_ref = refs

    z = z_ref[...]                                # (TILE_N, Dp), native dtype
    k_pad = et_ref.shape[1]

    # d2' = -2 z.e^T + ||e||^2   (||z||^2 dropped: row-constant, argmin-
    # invariant).  Native-dtype MXU matmul with f32 accumulation; padded
    # codebook rows carry +inf ||e||^2 so they can never win the argmin.
    cross = jnp.dot(z, et_ref[...], preferred_element_type=jnp.float32)   # (TILE_N, Kp)
    d2 = esq_ref[...] - 2.0 * cross                                       # (TILE_N, Kp) f32

    # First-occurrence argmin over the codebook axis (torch.argmin semantics).
    min_d = jnp.min(d2, axis=-1, keepdims=True)                           # (TILE_N, 1)
    col = lax.broadcasted_iota(jnp.int32, d2.shape, 1)
    idx_col = jnp.min(jnp.where(d2 <= min_d, col, k_pad),
                      axis=-1, keepdims=True)                             # (TILE_N, 1) i32
    idx_ref[...] = idx_col

    if ragged:  # only the padded-N case needs a valid-row mask for the loss
        row = (pl.program_id(0) * tile_n
               + lax.broadcasted_iota(jnp.int32, (tile_n, 1), 0))
        valid = (row < n_valid).astype(jnp.float32)                       # (TILE_N, 1)

    if with_zst:
        # Exact gather of the nearest codes via a 0/1 one-hot matmul (MXU);
        # exact in any dtype since weights are exactly 0 or 1.
        onehot = (col == idx_col).astype(e_ref.dtype)                     # (TILE_N, Kp)
        z_q = jnp.dot(onehot, e_ref[...],
                      preferred_element_type=jnp.float32)                 # (TILE_N, Dp) f32
        zf = z.astype(jnp.float32)
        diff = zf - z_q
        err = diff * diff
        if ragged:
            err = err * valid
        partial = jnp.sum(err)
        # straight-through: z + (1 - T) * (z_q - z) == z - (1 - T) * diff
        t = t_ref[0]
        zst_ref[...] = (zf - (1.0 - t) * diff).astype(zst_ref.dtype)
    else:
        # Index-only path: no gather matmul.  ||z - e_idx||^2 == ||z||^2 + min_d.
        zf = z.astype(jnp.float32)
        z_sq = jnp.sum(zf * zf, axis=-1, keepdims=True)                   # (TILE_N, 1)
        loss_rows = z_sq + min_d
        if ragged:
            loss_rows = loss_rows * valid
        partial = jnp.sum(loss_rows)

    # Per-tile partial sum; the global mean (/ N*D) is formed in the wrapper
    # so the N grid axis stays dependency-free ("parallel").
    loss_ref[...] = jnp.full(loss_ref.shape, partial, dtype=jnp.float32)


@functools.partial(jax.jit, static_argnames=("quantize", "tile_n"))
def quantizer_forward(z, e, quant_temp=0.0, quantize=True, tile_n=256):
    """Pallas equivalent of Quantizer.forward. Returns a dict like the module."""
    n, d = z.shape
    k, _ = e.shape

    d_pad = _round_up(max(d, _LANE), _LANE)
    # TODO(synk): pad K / pick TILE_N at 256 granularity per chip generation
    # (v6e/v7x MXUs are 256x256); 128 keeps work minimal for small codebooks.
    k_pad = _round_up(max(k, _LANE), _LANE)
    n_pad = _round_up(max(n, tile_n), tile_n)
    num_tiles = n_pad // tile_n
    ragged = n_pad != n

    # Pad once in the wrapper. Zero feature columns add 0 to every distance;
    # padded codebook rows get an +inf ||e||^2 sentinel; padded z rows are
    # masked out of the loss and sliced off the outputs.
    z_p = jnp.pad(z, ((0, n_pad - n), (0, d_pad - d)))
    e_p = jnp.pad(e, ((0, k_pad - k), (0, d_pad - d)))
    e_t = e_p.T                                                   # (Dp, Kp)
    e_sq = jnp.sum(e_p.astype(jnp.float32) ** 2, axis=-1)
    e_sq = jnp.where(jnp.arange(k_pad) < k, e_sq, jnp.inf).reshape(1, k_pad)

    kernel = functools.partial(_quantizer_kernel, tile_n=tile_n, n_valid=n,
                               ragged=ragged, with_zst=quantize)

    if quantize:
        t_arr = jnp.asarray(quant_temp, jnp.float32).reshape(1)
        in_arrays = [t_arr, z_p, e_t, e_p, e_sq]
        in_specs = [
            pl.BlockSpec(memory_space=pltpu.MemorySpace.SMEM),    # quant_temp
            pl.BlockSpec((tile_n, d_pad), lambda i: (i, 0)),      # z tile
            _resident_spec((d_pad, k_pad)),                       # e^T (resident)
            _resident_spec((k_pad, d_pad)),                       # e   (resident)
            _resident_spec((1, k_pad)),                           # ||e||^2
        ]
        out_shape = (
            jax.ShapeDtypeStruct((n_pad, d_pad), z.dtype),        # z_st
            jax.ShapeDtypeStruct((n_pad, 1), jnp.int32),          # indices
            jax.ShapeDtypeStruct((num_tiles, 1, _LANE), jnp.float32),  # loss
        )
        out_specs = (
            pl.BlockSpec((tile_n, d_pad), lambda i: (i, 0)),
            pl.BlockSpec((tile_n, 1), lambda i: (i, 0)),
            pl.BlockSpec((1, 1, _LANE), lambda i: (i, 0, 0)),
        )
    else:
        in_arrays = [z_p, e_t, e_sq]
        in_specs = [
            pl.BlockSpec((tile_n, d_pad), lambda i: (i, 0)),
            _resident_spec((d_pad, k_pad)),
            _resident_spec((1, k_pad)),
        ]
        out_shape = (
            jax.ShapeDtypeStruct((n_pad, 1), jnp.int32),
            jax.ShapeDtypeStruct((num_tiles, 1, _LANE), jnp.float32),
        )
        out_specs = (
            pl.BlockSpec((tile_n, 1), lambda i: (i, 0)),
            pl.BlockSpec((1, 1, _LANE), lambda i: (i, 0, 0)),
        )

    itemsize = jnp.dtype(z.dtype).itemsize
    e_itemsize = jnp.dtype(e.dtype).itemsize
    n_matmuls = 2 if quantize else 1
    flops = int(2 * n_matmuls * n_pad * k_pad * d_pad)
    bytes_accessed = int(
        n_pad * d_pad * itemsize
        + (2 if quantize else 1) * k_pad * d_pad * e_itemsize
        + k_pad * 4
        + (n_pad * d_pad * itemsize if quantize else 0)
        + n_pad * 4
        + num_tiles * _LANE * 4)

    outs = pl.pallas_call(
        kernel,
        grid=(num_tiles,),
        out_shape=out_shape,
        in_specs=in_specs,
        out_specs=out_specs,
        compiler_params=pltpu.CompilerParams(
            # TODO(synk): pltpu.CORE_PARALLEL on v7x to split tiles across
            # its two TensorCores; "parallel" is safe on all generations.
            dimension_semantics=("parallel",),
            vmem_limit_bytes=_vmem_limit_bytes(),
        ),
        cost_estimate=pl.CostEstimate(
            flops=flops, transcendentals=0, bytes_accessed=bytes_accessed),
    )(*in_arrays)

    if quantize:
        z_st_p, idx_p, loss_p = outs
    else:
        idx_p, loss_p = outs

    min_indices = idx_p[:n, 0]
    commit_loss = jnp.sum(loss_p[:, 0, 0]) / jnp.float32(n * d)

    data = {"min_indices": min_indices, "commit_loss": commit_loss}
    if quantize:
        z_st = z_st_p[:n, :d]
        data["ze"] = z
        data["z"] = z_st      # z + (1 - T) * (z_q - z)   (detach is a no-op fwd)
        data["zq"] = z_st     # module sets zq = the (reassigned) z
    else:
        data["z"] = z
    return data


def _reference(z, e, quant_temp):
    """Plain-JAX reference matching the PyTorch module semantics."""
    d2 = jnp.sum((z[:, None, :] - e[None, :, :]) ** 2, axis=-1)
    idx = jnp.argmin(d2, axis=1)
    z_q = e[idx]
    loss = jnp.mean((z - z_q) ** 2)
    z_st = z + (1.0 - quant_temp) * (z_q - z)
    return idx, loss, z_st


if __name__ == "__main__":
    key = jax.random.PRNGKey(0)
    kz, ke, kz2, ke2 = jax.random.split(key, 4)

    # z: (N, z_dim), codebook e: (K, z_dim)
    N, Z_DIM, K = 8, 32, 16
    z = jax.random.normal(kz, (N, Z_DIM), dtype=jnp.float32)
    e = jax.random.normal(ke, (K, Z_DIM), dtype=jnp.float32)
    T = 0.25

    out = quantizer_forward(z, e, quant_temp=T, quantize=True)
    jax.block_until_ready(out)

    ref_idx, ref_loss, ref_zst = _reference(z, e, T)
    assert jnp.all(out["min_indices"] == ref_idx)
    assert jnp.allclose(out["commit_loss"], ref_loss, atol=1e-4, rtol=1e-4)
    assert jnp.allclose(out["z"], ref_zst, atol=1e-5, rtol=1e-5)
    assert jnp.allclose(out["zq"], ref_zst, atol=1e-5, rtol=1e-5)
    assert jnp.allclose(out["ze"], z)

    # Second shape exercising multiple N tiles + padding of N/K/D (ragged N).
    N2, Z2, K2 = 300, 48, 50
    z2 = jax.random.normal(kz2, (N2, Z2), dtype=jnp.float32)
    e2 = jax.random.normal(ke2, (K2, Z2), dtype=jnp.float32)
    out2 = quantizer_forward(z2, e2, quant_temp=0.0, quantize=True)
    jax.block_until_ready(out2)
    ref_idx2, ref_loss2, ref_zst2 = _reference(z2, e2, 0.0)
    assert jnp.all(out2["min_indices"] == ref_idx2)
    assert jnp.allclose(out2["commit_loss"], ref_loss2, atol=1e-4, rtol=1e-4)
    assert jnp.allclose(out2["z"], ref_zst2, atol=1e-5, rtol=1e-5)

    # quantize=False path: indices + loss only (loss via the expanded-form
    # ||z||^2 + min_d identity, so tolerance reflects MXU-distance rounding).
    out3 = quantizer_forward(z, e, quant_temp=T, quantize=False)
    jax.block_until_ready(out3)
    assert jnp.all(out3["min_indices"] == ref_idx)
    assert jnp.allclose(out3["commit_loss"], ref_loss, atol=2e-3, rtol=2e-3)
    assert jnp.allclose(out3["z"], z)
    assert "zq" not in out3

    print("KERNEL_OK")
</pallas_src>

<mosaic_0001>
module attributes {stable_mosaic.version = 11 : i64} {
  func.func @_quantizer_kernel(%arg0: i32, %arg1: memref<1xf32, #tpu.memory_space<smem>>, %arg2: memref<256x128xf32, #tpu.memory_space<vmem>>, %arg3: memref<128x128xf32, #tpu.memory_space<vmem>>, %arg4: memref<128x128xf32, #tpu.memory_space<vmem>>, %arg5: memref<1x128xf32, #tpu.memory_space<vmem>>, %arg6: memref<256x128xf32, #tpu.memory_space<vmem>>, %arg7: memref<256x1xi32, #tpu.memory_space<vmem>>, %arg8: memref<1x1x128xf32, #tpu.memory_space<vmem>>) attributes {dimension_semantics = [#tpu.dimension_semantics<parallel>], iteration_bounds = array<i64: 1>, scalar_prefetch = 0 : i64, scratch_operands = 0 : i64, tpu.core_type = #tpu.core_type<tc>, window_params = [{transform_indices = @transform_0, window_bounds = array<i64: 1>}, {transform_indices = @transform_1, window_bounds = array<i64: 256, 128>}, {pipeline_mode = #tpu.pipeline_mode<synchronous>, transform_indices = @transform_2, window_bounds = array<i64: 128, 128>}, {pipeline_mode = #tpu.pipeline_mode<synchronous>, transform_indices = @transform_3, window_bounds = array<i64: 128, 128>}, {pipeline_mode = #tpu.pipeline_mode<synchronous>, transform_indices = @transform_4, window_bounds = array<i64: 1, 128>}, {transform_indices = @transform_5, window_bounds = array<i64: 256, 128>}, {transform_indices = @transform_6, window_bounds = array<i64: 256, 1>}, {transform_indices = @transform_7, window_bounds = array<i64: 1, 1, 128>}]} {
    %c0 = arith.constant 0 : index
    %c0_0 = arith.constant 0 : index
    %0 = vector.load %arg2[%c0, %c0_0] : memref<256x128xf32, #tpu.memory_space<vmem>>, vector<256x128xf32>
    %c0_1 = arith.constant 0 : index
    %c0_2 = arith.constant 0 : index
    %1 = vector.load %arg3[%c0_1, %c0_2] : memref<128x128xf32, #tpu.memory_space<vmem>>, vector<128x128xf32>
    %cst = arith.constant dense<0.000000e+00> : vector<256x128xf32>
    %2 = tpu.matmul %0, %1, %cst {dimension_numbers = #tpu.dot_dimension_numbers<[1], [0], [0], [1], [0, 0, 1, 1], [], []>} : vector<256x128xf32>, vector<128x128xf32>, vector<256x128xf32> -> vector<256x128xf32>
    %c0_3 = arith.constant 0 : index
    %c0_4 = arith.constant 0 : index
    %3 = vector.load %arg5[%c0_3, %c0_4] : memref<1x128xf32, #tpu.memory_space<vmem>>, vector<1x128xf32>
    %cst_5 = arith.constant 2.000000e+00 : f32
    %4 = vector.broadcast %cst_5 : f32 to vector<256x128xf32>
    %5 = arith.mulf %4, %2 : vector<256x128xf32>
    %6 = vector.broadcast %3 : vector<1x128xf32> to vector<256x128xf32>
    %7 = arith.subf %6, %5 : vector<256x128xf32>
    %cst_6 = arith.constant dense<0x7F800000> : vector<256xf32>
    %8 = vector.multi_reduction <minimumf>, %7, %cst_6 [1] : vector<256x128xf32> to vector<256xf32>
    %9 = vector.shape_cast %8 : vector<256xf32> to vector<256x1xf32>
    %10 = tpu.iota {dimensions = array<i32: 1>} : vector<256x128xi32>
    %11 = vector.broadcast %9 : vector<256x1xf32> to vector<256x128xf32>
    %12 = arith.cmpf ole, %7, %11 : vector<256x128xf32>
    %c128_i32 = arith.constant 128 : i32
    %13 = vector.broadcast %c128_i32 : i32 to vector<256x128xi32>
    %14 = arith.select %12, %10, %13 : vector<256x128xi1>, vector<256x128xi32>
    %cst_7 = arith.constant dense<2147483647> : vector<256xi32>
    %15 = vector.multi_reduction <minsi>, %14, %cst_7 [1] : vector<256x128xi32> to vector<256xi32>
    %16 = vector.shape_cast %15 : vector<256xi32> to vector<256x1xi32>
    %c0_8 = arith.constant 0 : index
    %c0_9 = arith.constant 0 : index
    %17 = vector.load %arg7[%c0_8, %c0_9] : memref<256x1xi32, #tpu.memory_space<vmem>>, vector<256x1xi32>
    tpu.vector_store %arg7[%c0_8, %c0_9], %16 {strides = array<i32>} : memref<256x1xi32, #tpu.memory_space<vmem>>, vector<256x1xi32>,
    %c256_i32 = arith.constant 256 : i32
    %18 = arith.muli %arg0, %c256_i32 : i32
    %19 = tpu.iota {dimensions = array<i32: 0>} : vector<256x1xi32>
    %20 = vector.broadcast %18 : i32 to vector<256x1xi32>
    %21 = arith.addi %20, %19 : vector<256x1xi32>
    %c8_i32 = arith.constant 8 : i32
    %22 = vector.broadcast %c8_i32 : i32 to vector<256x1xi32>
    %23 = arith.cmpi slt, %21, %22 : vector<256x1xi32>
    %24 = arith.extui %23 : vector<256x1xi1> to vector<256x1xi32>
    %25 = arith.sitofp %24 : vector<256x1xi32> to vector<256x1xf32>
    %26 = vector.broadcast %16 : vector<256x1xi32> to vector<256x128xi32>
    %27 = arith.cmpi eq, %10, %26 : vector<256x128xi32>
    %28 = arith.extui %27 : vector<256x128xi1> to vector<256x128xi32>
    %29 = arith.sitofp %28 : vector<256x128xi32> to vector<256x128xf32>
    %c0_10 = arith.constant 0 : index
    %c0_11 = arith.constant 0 : index
    %30 = vector.load %arg4[%c0_10, %c0_11] : memref<128x128xf32, #tpu.memory_space<vmem>>, vector<128x128xf32>
    %cst_12 = arith.constant dense<0.000000e+00> : vector<256x128xf32>
    %31 = tpu.matmul %29, %30, %cst_12 {dimension_numbers = #tpu.dot_dimension_numbers<[1], [0], [0], [1], [0, 0, 1, 1], [], []>} : vector<256x128xf32>, vector<128x128xf32>, vector<256x128xf32> -> vector<256x128xf32>
    %32 = arith.subf %0, %31 : vector<256x128xf32>
    %33 = arith.mulf %32, %32 : vector<256x128xf32>
    %34 = vector.broadcast %25 : vector<256x1xf32> to vector<256x128xf32>
    %35 = arith.mulf %33, %34 : vector<256x128xf32>
    %36 = vector.shape_cast %35 : vector<256x128xf32> to vector<1x256x128xf32>
    %cst_13 = arith.constant dense<0.000000e+00> : vector<1xf32>
    %37 = vector.multi_reduction <add>, %36, %cst_13 [1, 2] : vector<1x256x128xf32> to vector<1xf32>
    %38 = vector.shape_cast %37 : vector<1xf32> to vector<1x1x1xf32>
    %39 = vector.extract %38[0, 0, 0] : f32 from vector<1x1x1xf32>
    %c0_14 = arith.constant 0 : index
    %40 = memref.load %arg1[%c0_14] : memref<1xf32, #tpu.memory_space<smem>>
    %cst_15 = arith.constant 1.000000e+00 : f32
    %41 = arith.subf %cst_15, %40 : f32
    %42 = vector.broadcast %41 : f32 to vector<256x128xf32>
    %43 = arith.mulf %42, %32 : vector<256x128xf32>
    %44 = arith.subf %0, %43 : vector<256x128xf32>
    %c0_16 = arith.constant 0 : index
    %c0_17 = arith.constant 0 : index
    %45 = vector.load %arg6[%c0_16, %c0_17] : memref<256x128xf32, #tpu.memory_space<vmem>>, vector<256x128xf32>
    tpu.vector_store %arg6[%c0_16, %c0_17], %44 {strides = array<i32>} : memref<256x128xf32, #tpu.memory_space<vmem>>, vector<256x128xf32>,
    %46 = vector.broadcast %39 : f32 to vector<1x1x128xf32>
    %c0_18 = arith.constant 0 : index
    %c0_19 = arith.constant 0 : index
    %c0_20 = arith.constant 0 : index
    %47 = vector.load %arg8[%c0_18, %c0_19, %c0_20] : memref<1x1x128xf32, #tpu.memory_space<vmem>>, vector<1x1x128xf32>
    tpu.vector_store %arg8[%c0_18, %c0_19, %c0_20], %46 {strides = array<i32>} : memref<1x1x128xf32, #tpu.memory_space<vmem>>, vector<1x1x128xf32>,
    return
  }
  func.func @transform_0(%arg0: i32) -> i32 {
    %c0_i32 = arith.constant 0 : i32
    %c0_i32_0 = arith.constant 0 : i32
    return %c0_i32 : i32
  }
  func.func @transform_1(%arg0: i32) -> (i32, i32) {
    %c0_i32 = arith.constant 0 : i32
    %c0_i32_0 = arith.constant 0 : i32
    return %arg0, %c0_i32 : i32, i32
  }
  func.func @transform_2(%arg0: i32) -> (i32, i32) {
    %c0_i32 = arith.constant 0 : i32
    %c0_i32_0 = arith.constant 0 : i32
    %c0_i32_1 = arith.constant 0 : i32
    return %c0_i32, %c0_i32_0 : i32, i32
  }
  func.func @transform_3(%arg0: i32) -> (i32, i32) {
    %c0_i32 = arith.constant 0 : i32
    %c0_i32_0 = arith.constant 0 : i32
    %c0_i32_1 = arith.constant 0 : i32
    return %c0_i32, %c0_i32_0 : i32, i32
  }
  func.func @transform_4(%arg0: i32) -> (i32, i32) {
    %c0_i32 = arith.constant 0 : i32
    %c0_i32_0 = arith.constant 0 : i32
    %c0_i32_1 = arith.constant 0 : i32
    return %c0_i32, %c0_i32_0 : i32, i32
  }
  func.func @transform_5(%arg0: i32) -> (i32, i32) {
    %c0_i32 = arith.constant 0 : i32
    %c0_i32_0 = arith.constant 0 : i32
    return %arg0, %c0_i32 : i32, i32
  }
  func.func @transform_6(%arg0: i32) -> (i32, i32) {
    %c0_i32 = arith.constant 0 : i32
    %c0_i32_0 = arith.constant 0 : i32
    return %arg0, %c0_i32 : i32, i32
  }
  func.func @transform_7(%arg0: i32) -> (i32, i32, i32) {
    %c0_i32 = arith.constant 0 : i32
    %c0_i32_0 = arith.constant 0 : i32
    %c0_i32_1 = arith.constant 0 : i32
    return %arg0, %c0_i32, %c0_i32_0 : i32, i32, i32
  }
}

</mosaic_0001>

<bundles_post_ra>
// kernel: quantizer_forward.1
= control target key start
LH: loop header
LB: loop body
LE: loop exit
PB: predicated region body
PF: predicated region fallthrough
CT: control target
= control target key end

     0   :  { %s3324_s2 = inlined_call_operand.vmem [shape: f32[128,128], index: 2, kind: input, shape index: {}]   ;;  %s3325_s1 = inlined_call_operand.vmem [shape: f32[256,128], index: 1, kind: input, shape index: {}]   ;;  %s3326_s4 = inlined_call_operand.vmem [shape: f32[1,128], index: 4, kind: input, shape index: {}]   ;;  %s3327_s3 = inlined_call_operand.vmem [shape: f32[128,128], index: 3, kind: input, shape index: {}]   ;;  %s3328_s6 = inlined_call_operand.vmem [shape: s32[256,1], index: 6, kind: output, shape index: {1}]   ;;  %s3329_s0 = inlined_call_operand.<no memory space> [shape: f32[1], index: 0, kind: input, shape index: {}]   ;;  %s3330_s5 = inlined_call_operand.vmem [shape: f32[256,128], index: 5, kind: output, shape index: {0}]   ;;  %s3331_s7 = inlined_call_operand.vmem [shape: f32[1,1,128], index: 7, kind: output, shape index: {2}]  }
   0x1   :  { %v71_v0 = vld [vmem:[%s3324_s2 + $0x78] sm:$0xff]  ;;  %v70_v1 = vld [vmem:[%s3324_s2 + $0x70] sm:$0xff]  ;;  %v69_v2 = vld [vmem:[%s3324_s2 + $0x68] sm:$0xff]  ;;  %s1616_s22 = ssub.f32 1.0, %s3329_s0 }
   0x2   :  { %1889 = vmatprep.subr.mxu0 %v71_v0  ;;  %v68_v3 = vld [vmem:[%s3324_s2 + $0x60] sm:$0xff]  ;;  %v67_v5 = vld [vmem:[%s3324_s2 + $0x58] sm:$0xff]  ;;  %v66_v6 = vld [vmem:[%s3324_s2 + $0x50] sm:$0xff] }
   0x3   :  { %1890 = vmatpush3.msra.mxu0 %v71_v0  ;;  %v24_v4 = vld [vmem:[%s3325_s1] sm:$0xff]  ;;  %v65_v7 = vld [vmem:[%s3324_s2 + $0x48] sm:$0xff]  ;;  %v63_v9 = vld [vmem:[%s3324_s2 + $0x38] sm:$0xff] }
   0x4   :  { %1891 = vmatprep.subr.mxu0 %v70_v1  ;;  %1921 = vmatprep.mubr.f32.mxu0 %v24_v4  ;;  %v64_v8 = vld [vmem:[%s3324_s2 + $0x40] sm:$0xff]  ;;  %v62_v10 = vld [vmem:[%s3324_s2 + $0x30] sm:$0xff]  ;;  %v61_v11 = vld [vmem:[%s3324_s2 + $0x28] sm:$0xff] }
   0x5   :  { %1892 = vmatpush3.msra.mxu0 %v70_v1  ;;  %v60_v12 = vld [vmem:[%s3324_s2 + $0x20] sm:$0xff]  ;;  %v59_v13 = vld [vmem:[%s3324_s2 + $0x18] sm:$0xff]  ;;  %v58_v14 = vld [vmem:[%s3324_s2 + $0x10] sm:$0xff] }
   0x6   :  { %1893 = vmatprep.subr.mxu0 %v69_v2  ;;  %v57_v15 = vld [vmem:[%s3324_s2 + $0x8] sm:$0xff]  ;;  %v56_v16 = vld [vmem:[%s3324_s2] sm:$0xff]  ;;  %v26_v18 = vld [vmem:[%s3325_s1 + $0x10] sm:$0xff] }
   0x7   :  { %1894 = vmatpush3.msra.mxu0 %v69_v2  ;;  %v25_v17 = vld [vmem:[%s3325_s1 + $0x8] sm:$0xff]  ;;  %v27_v19 = vld [vmem:[%s3325_s1 + $0x18] sm:$0xff]  ;;  %v28_v20 = vld [vmem:[%s3325_s1 + $0x20] sm:$0xff] }
   0x8   :  { %1895 = vmatprep.subr.mxu0 %v68_v3  ;;  %v29_v21 = vld [vmem:[%s3325_s1 + $0x28] sm:$0xff]  ;;  %v30_v22 = vld [vmem:[%s3325_s1 + $0x30] sm:$0xff]  ;;  %v31_v23 = vld [vmem:[%s3325_s1 + $0x38] sm:$0xff] }
   0x9   :  { %1896 = vmatpush3.msra.mxu0 %v68_v3  ;;  %v32_v24 = vld [vmem:[%s3325_s1 + $0x40] sm:$0xff]  ;;  %v33_v25 = vld [vmem:[%s3325_s1 + $0x48] sm:$0xff]  ;;  %v34_v26 = vld [vmem:[%s3325_s1 + $0x50] sm:$0xff] }
   0xa   :  { %1897 = vmatprep.subr.mxu0 %v67_v5  ;;  %v35_v27 = vld [vmem:[%s3325_s1 + $0x58] sm:$0xff]  ;;  %v36_v28 = vld [vmem:[%s3325_s1 + $0x60] sm:$0xff]  ;;  %v37_v29 = vld [vmem:[%s3325_s1 + $0x68] sm:$0xff] }
   0xb   :  { %1898 = vmatpush3.msra.mxu0 %v67_v5  ;;  %v38_v30 = vld [vmem:[%s3325_s1 + $0x70] sm:$0xff]  ;;  %v39_v31 = vld [vmem:[%s3325_s1 + $0x78] sm:$0xff]  ;;  %v40_v32 = vld [vmem:[%s3325_s1 + $0x80] sm:$0xff] }
   0xc   :  { %1899 = vmatprep.subr.mxu0 %v66_v6  ;;  %v41_v33 = vld [vmem:[%s3325_s1 + $0x88] sm:$0xff]  ;;  %v42_v34 = vld [vmem:[%s3325_s1 + $0x90] sm:$0xff]  ;;  %v43_v35 = vld [vmem:[%s3325_s1 + $0x98] sm:$0xff] }
   0xd   :  { %1900 = vmatpush3.msra.mxu0 %v66_v6  ;;  %v44_v36 = vld [vmem:[%s3325_s1 + $0xa0] sm:$0xff]  ;;  %v45_v37 = vld [vmem:[%s3325_s1 + $0xa8] sm:$0xff]  ;;  %v46_v38 = vld [vmem:[%s3325_s1 + $0xb0] sm:$0xff] }
   0xe   :  { %1901 = vmatprep.subr.mxu0 %v65_v7  ;;  %v47_v39 = vld [vmem:[%s3325_s1 + $0xb8] sm:$0xff]  ;;  %v48_v40 = vld [vmem:[%s3325_s1 + $0xc0] sm:$0xff]  ;;  %v49_v41 = vld [vmem:[%s3325_s1 + $0xc8] sm:$0xff] }
   0xf   :  { %1902 = vmatpush3.msra.mxu0 %v65_v7  ;;  %v50_v42 = vld [vmem:[%s3325_s1 + $0xd0] sm:$0xff]  ;;  %v51_v43 = vld [vmem:[%s3325_s1 + $0xd8] sm:$0xff]  ;;  %v52_v44 = vld [vmem:[%s3325_s1 + $0xe0] sm:$0xff] }
  0x10   :  { %1903 = vmatprep.subr.mxu0 %v64_v8  ;;  %v53_v45 = vld [vmem:[%s3325_s1 + $0xe8] sm:$0xff]  ;;  %v54_v46 = vld [vmem:[%s3325_s1 + $0xf0] sm:$0xff]  ;;  %v55_v47 = vld [vmem:[%s3325_s1 + $0xf8] sm:$0xff] }
  0x11   :  { %1904 = vmatpush3.msra.mxu0 %v64_v8  ;;  %v2272_v52 = vld [vmem:[%s3326_s4] ss:$0 sm:$0xff] }
  0x12   :  { %1905 = vmatprep.subr.mxu0 %v63_v9 }
  0x13   :  { %1906 = vmatpush3.msra.mxu0 %v63_v9 }
  0x14   :  { %1907 = vmatprep.subr.mxu0 %v62_v10 }
  0x15   :  { %1908 = vmatpush3.msra.mxu0 %v62_v10 }
  0x16   :  { %1909 = vmatprep.subr.mxu0 %v61_v11 }
  0x17   :  { %1910 = vmatpush3.msra.mxu0 %v61_v11 }
  0x18   :  { %1911 = vmatprep.subr.mxu0 %v60_v12 }
  0x19   :  { %1912 = vmatpush3.msra.mxu0 %v60_v12 }
  0x1a   :  { %1913 = vmatprep.subr.mxu0 %v59_v13 }
  0x1b   :  { %1914 = vmatpush3.msra.mxu0 %v59_v13 }
  0x1c   :  { %1915 = vmatprep.subr.mxu0 %v58_v14 }
  0x1d   :  { %1916 = vmatpush3.msra.mxu0 %v58_v14 }
  0x1e   :  { %1917 = vmatprep.subr.mxu0 %v57_v15 }
  0x1f   :  { %1918 = vmatpush3.msra.mxu0 %v57_v15 }
  0x20   :  { %1919 = vmatprep.subr.mxu0 %v56_v16 }
  0x21   :  { %1920 = vmatpush3.msra.mxu0 %v56_v16 }
  0x22   :  { %1922 = vmatmul.mubr.f32.vlgmr.msra.gmra.mxu0 %v25_v17 }
  0x23   :  { %1924 = vmatprep.mubr.f32.mxu0 %v26_v18 }
  0x26   :  { %1925 = vmatmul.mubr.f32.gmra.mxu0 %v27_v19 }
  0x27   :  { %1927 = vmatprep.mubr.f32.mxu0 %v28_v20 }
  0x2a   :  { %1928 = vmatmul.mubr.f32.gmra.mxu0 %v29_v21 }
  0x2b   :  { %1930 = vmatprep.mubr.f32.mxu0 %v30_v22 }
  0x2e   :  { %1931 = vmatmul.mubr.f32.gmra.mxu0 %v31_v23 }
  0x2f   :  { %1933 = vmatprep.mubr.f32.mxu0 %v32_v24 }
  0x32   :  { %1934 = vmatmul.mubr.f32.gmra.mxu0 %v33_v25 }
  0x33   :  { %1936 = vmatprep.mubr.f32.mxu0 %v34_v26 }
  0x36   :  { %1937 = vmatmul.mubr.f32.gmra.mxu0 %v35_v27 }
  0x37   :  { %1939 = vmatprep.mubr.f32.mxu0 %v36_v28 }
  0x3a   :  { %1940 = vmatmul.mubr.f32.gmra.mxu0 %v37_v29 }
  0x3b   :  { %1942 = vmatprep.mubr.f32.mxu0 %v38_v30 }
  0x3e   :  { %1943 = vmatmul.mubr.f32.gmra.mxu0 %v39_v31 }
  0x3f   :  { %1945 = vmatprep.mubr.f32.mxu0 %v40_v32 }
  0x42   :  { %1946 = vmatmul.mubr.f32.gmra.mxu0 %v41_v33 }
  0x43   :  { %1948 = vmatprep.mubr.f32.mxu0 %v42_v34 }
  0x46   :  { %1949 = vmatmul.mubr.f32.gmra.mxu0 %v43_v35 }
  0x47   :  { %1951 = vmatprep.mubr.f32.mxu0 %v44_v36 }
  0x4a   :  { %1952 = vmatmul.mubr.f32.gmra.mxu0 %v45_v37 }
  0x4b   :  { %1954 = vmatprep.mubr.f32.mxu0 %v46_v38 }
  0x4e   :  { %1955 = vmatmul.mubr.f32.gmra.mxu0 %v47_v39 }
  0x4f   :  { %1957 = vmatprep.mubr.f32.mxu0 %v48_v40 }
  0x52   :  { %1958 = vmatmul.mubr.f32.gmra.mxu0 %v49_v41 }
  0x53   :  { %1960 = vmatprep.mubr.f32.mxu0 %v50_v42 }
  0x56   :  { %1961 = vmatmul.mubr.f32.gmra.mxu0 %v51_v43 }
  0x57   :  { %1963 = vmatprep.mubr.f32.mxu0 %v52_v44 }
  0x5a   :  { %1964 = vmatmul.mubr.f32.gmra.mxu0 %v53_v45 }
  0x5b   :  { %1966 = vmatprep.mubr.f32.mxu0 %v54_v46 }
  0x5e   :  { %1967 = vmatmul.mubr.f32.gmra.mxu0 %v55_v47 }
  0xe2   :  { %v1923_v48 = vpop.f32.mrf.mxu0 }
  0xe3   :  { %v299_v53 = vmul.f32 2.0, %v1923_v48 }
  0xe4   :  { %v138_v49 = vpop.f32.mrf.mxu0 }
  0xe5   :  { %v298_v50 = vmul.f32 2.0, %v138_v49  ;;  %v2279_v59 = vsub.f32 %v2272_v52, %v299_v53 }
  0xe6   :  { %v1926_v51 = vpop.f32.mrf.mxu0 }
  0xe7   :  { %v2275_v54 = vsub.f32 %v2272_v52, %v298_v50  ;;  %v301_v58 = vmul.f32 2.0, %v1926_v51 }
  0xe8   :  { %v148_v55 = vpop.f32.mrf.mxu0 }
  0xe9   :  { %v300_v56 = vmul.f32 2.0, %v148_v55  ;;  %368 = vmin.xlane.f32.xlu0 %v2275_v54  ;;  %v2287_v1 = vsub.f32 %v2272_v52, %v301_v58 }
  0xea   :  { %v1929_v57 = vpop.f32.mrf.mxu0 }
  0xeb   :  { %v2282_v60 = vsub.f32 %v2272_v52, %v300_v56  ;;  %v303_v0 = vmul.f32 2.0, %v1929_v57 }
  0xec   :  { %v158_v61 = vpop.f32.mrf.mxu0 }
  0xed   :  { %v302_v62 = vmul.f32 2.0, %v158_v61  ;;  %370 = vmin.xlane.f32.xlu0 %v2279_v59  ;;  %372 = vmin.xlane.f32.xlu1 %v2282_v60  ;;  %v2295_v7 = vsub.f32 %v2272_v52, %v303_v0 }
  0xee   :  { %v1932_v63 = vpop.f32.mrf.mxu0 }
  0xef   :  { %v2290_v2 = vsub.f32 %v2272_v52, %v302_v62  ;;  %v305_v6 = vmul.f32 2.0, %v1932_v63 }
  0xf0   :  { %v168_v3 = vpop.f32.mrf.mxu0 }
  0xf1   :  { %v304_v4 = vmul.f32 2.0, %v168_v3  ;;  %374 = vmin.xlane.f32.xlu1 %v2287_v1  ;;  %376 = vmin.xlane.f32.xlu0 %v2290_v2  ;;  %v2303_v13 = vsub.f32 %v2272_v52, %v305_v6 }
  0xf2   :  { %v1935_v5 = vpop.f32.mrf.mxu0 }
  0xf3   :  { %v2298_v8 = vsub.f32 %v2272_v52, %v304_v4  ;;  %v307_v12 = vmul.f32 2.0, %v1935_v5 }
  0xf4   :  { %v178_v9 = vpop.f32.mrf.mxu0 }
  0xf5   :  { %v306_v10 = vmul.f32 2.0, %v178_v9  ;;  %378 = vmin.xlane.f32.xlu1 %v2295_v7  ;;  %380 = vmin.xlane.f32.xlu0 %v2298_v8  ;;  %v2311_v19 = vsub.f32 %v2272_v52, %v307_v12 }
  0xf6   :  { %v1938_v11 = vpop.f32.mrf.mxu0 }
  0xf7   :  { %v2306_v14 = vsub.f32 %v2272_v52, %v306_v10  ;;  %v309_v18 = vmul.f32 2.0, %v1938_v11 }
  0xf8   :  { %v188_v15 = vpop.f32.mrf.mxu0 }
  0xf9   :  { %v308_v16 = vmul.f32 2.0, %v188_v15  ;;  %382 = vmin.xlane.f32.xlu1 %v2303_v13  ;;  %384 = vmin.xlane.f32.xlu0 %v2306_v14  ;;  %v2319_v25 = vsub.f32 %v2272_v52, %v309_v18 }
  0xfa   :  { %v1941_v17 = vpop.f32.mrf.mxu0 }
  0xfb   :  { %v2314_v20 = vsub.f32 %v2272_v52, %v308_v16  ;;  %v311_v24 = vmul.f32 2.0, %v1941_v17 }
  0xfc   :  { %v198_v21 = vpop.f32.mrf.mxu0 }
  0xfd   :  { %v310_v22 = vmul.f32 2.0, %v198_v21  ;;  %386 = vmin.xlane.f32.xlu1 %v2311_v19  ;;  %388 = vmin.xlane.f32.xlu0 %v2314_v20  ;;  %v2327_v31 = vsub.f32 %v2272_v52, %v311_v24 }
  0xfe   :  { %v1944_v23 = vpop.f32.mrf.mxu0 }
  0xff   :  { %v2322_v26 = vsub.f32 %v2272_v52, %v310_v22  ;;  %v313_v30 = vmul.f32 2.0, %v1944_v23 }
 0x100   :  { %v208_v27 = vpop.f32.mrf.mxu0 }
 0x101   :  { %v312_v28 = vmul.f32 2.0, %v208_v27  ;;  %390 = vmin.xlane.f32.xlu1 %v2319_v25  ;;  %392 = vmin.xlane.f32.xlu0 %v2322_v26  ;;  %v2335_v37 = vsub.f32 %v2272_v52, %v313_v30 }
 0x102   :  { %v1947_v29 = vpop.f32.mrf.mxu0 }
 0x103   :  { %v2330_v32 = vsub.f32 %v2272_v52, %v312_v28  ;;  %v315_v36 = vmul.f32 2.0, %v1947_v29 }
 0x104   :  { %v218_v33 = vpop.f32.mrf.mxu0 }
 0x105   :  { %v314_v34 = vmul.f32 2.0, %v218_v33  ;;  %394 = vmin.xlane.f32.xlu1 %v2327_v31  ;;  %396 = vmin.xlane.f32.xlu0 %v2330_v32  ;;  %v2343_v43 = vsub.f32 %v2272_v52, %v315_v36  ;;  %v432_v33 = vlaneseq }
 0x106   :  { %v1950_v35 = vpop.f32.mrf.mxu0 }
 0x107   :  { %v2338_v38 = vsub.f32 %v2272_v52, %v314_v34  ;;  %v317_v42 = vmul.f32 2.0, %v1950_v35  ;;  %v2402_v34 = vand.u32 127, %v432_v33 }
 0x108   :  { %v228_v39 = vpop.f32.mrf.mxu0 }
 0x109   :  { %v316_v40 = vmul.f32 2.0, %v228_v39  ;;  %398 = vmin.xlane.f32.xlu1 %v2335_v37  ;;  %400 = vmin.xlane.f32.xlu0 %v2338_v38  ;;  %v2351_v49 = vsub.f32 %v2272_v52, %v317_v42  ;;  %3344 = vst [vmem:[#allocation3_spill] sm:$0xff] %v2402_v34 }
 0x10a   :  { %v1953_v41 = vpop.f32.mrf.mxu0 }
 0x10b   :  { %v2346_v44 = vsub.f32 %v2272_v52, %v316_v40  ;;  %v319_v48 = vmul.f32 2.0, %v1953_v41 }
 0x10c   :  { %v238_v45 = vpop.f32.mrf.mxu0 }
 0x10d   :  { %v318_v46 = vmul.f32 2.0, %v238_v45  ;;  %402 = vmin.xlane.f32.xlu1 %v2343_v43  ;;  %404 = vmin.xlane.f32.xlu0 %v2346_v44  ;;  %v2359_v57 = vsub.f32 %v2272_v52, %v319_v48 }
 0x10e   :  { %v1956_v47 = vpop.f32.mrf.mxu0 }
 0x10f   :  { %v2354_v50 = vsub.f32 %v2272_v52, %v318_v46  ;;  %v321_v56 = vmul.f32 2.0, %v1956_v47 }
 0x110   :  { %v248_v51 = vpop.f32.mrf.mxu0 }
 0x111   :  { %v320_v53 = vmul.f32 2.0, %v248_v51  ;;  %406 = vmin.xlane.f32.xlu1 %v2351_v49  ;;  %408 = vmin.xlane.f32.xlu0 %v2354_v50  ;;  %v2367_v3 = vsub.f32 %v2272_v52, %v321_v56 }
 0x112   :  { %v1959_v55 = vpop.f32.mrf.mxu0 }
 0x113   :  { %v2362_v58 = vsub.f32 %v2272_v52, %v320_v53  ;;  %v323_v0 = vmul.f32 2.0, %v1959_v55 }
 0x114   :  { %v258_v61 = vpop.f32.mrf.mxu0 }
 0x115   :  { %v322_v62 = vmul.f32 2.0, %v258_v61  ;;  %410 = vmin.xlane.f32.xlu1 %v2359_v57  ;;  %412 = vmin.xlane.f32.xlu0 %v2362_v58  ;;  %v2375_v11 = vsub.f32 %v2272_v52, %v323_v0 }
 0x116   :  { %v1962_v63 = vpop.f32.mrf.mxu0 }
 0x117   :  { %v2370_v4 = vsub.f32 %v2272_v52, %v322_v62  ;;  %v325_v10 = vmul.f32 2.0, %v1962_v63 }
 0x118   :  { %v268_v5 = vpop.f32.mrf.mxu0 }
 0x119   :  { %v324_v6 = vmul.f32 2.0, %v268_v5  ;;  %414 = vmin.xlane.f32.xlu1 %v2367_v3  ;;  %416 = vmin.xlane.f32.xlu0 %v2370_v4  ;;  %v2383_v21 = vsub.f32 %v2272_v52, %v325_v10 }
 0x11a   :  { %v1965_v9 = vpop.f32.mrf.mxu0 }
 0x11b   :  { %v2378_v12 = vsub.f32 %v2272_v52, %v324_v6  ;;  %v327_v18 = vmul.f32 2.0, %v1965_v9 }
 0x11c   :  { %v278_v15 = vpop.f32.mrf.mxu0 }
 0x11d   :  { %v326_v16 = vmul.f32 2.0, %v278_v15  ;;  %418 = vmin.xlane.f32.xlu1 %v2375_v11  ;;  %420 = vmin.xlane.f32.xlu0 %v2378_v12  ;;  %v2391_v28 = vsub.f32 %v2272_v52, %v327_v18 }
 0x11e   :  { %v1968_v17 = vpop.f32.mrf.mxu0 }
 0x11f   :  { %v2386_v22 = vsub.f32 %v2272_v52, %v326_v16  ;;  %v329_v27 = vmul.f32 2.0, %v1968_v17 }
 0x120   :  { %v288_v23 = vpop.f32.mrf.mxu0 }
 0x121   :  { %v328_v24 = vmul.f32 2.0, %v288_v23  ;;  %422 = vmin.xlane.f32.xlu1 %v2383_v21  ;;  %424 = vmin.xlane.f32.xlu0 %v2386_v22  ;;  %v2399_v30 = vsub.f32 %v2272_v52, %v329_v27 }
 0x123   :  { %v2394_v29 = vsub.f32 %v2272_v52, %v328_v24 }
 0x125   :  { %426 = vmin.xlane.f32.xlu1 %v2391_v28  ;;  %428 = vmin.xlane.f32.xlu0 %v2394_v29 }
 0x129   :  { %430 = vmin.xlane.f32.xlu1 %v2399_v30 }
 0x172   :  { %v369_v35 = vpop.xlane.xlu0 %368 }
 0x173   :  { %vm434_vm0 = vcmp.le.f32.partialorder %v2275_v54, %v369_v35 }
 0x174   :  { %v2406_v36 = vsel %vm434_vm0, %v2402_v34, 128 }
 0x175   :  { %v499_v39 = vshra.s32 %v2406_v36, 16 }
 0x176   :  { %v371_v40 = vpop.xlane.xlu0 %370  ;;  %v373_v41 = vpop.xlane.xlu1 %372 }
 0x177   :  { %vm435_vm1 = vcmp.le.f32.partialorder %v2279_v59, %v371_v40  ;;  %vm436_vm2 = vcmp.le.f32.partialorder %v2282_v60, %v373_v41  ;;  %v2411_v52 = vcvt.s32.f32 %v499_v39 }
 0x178   :  { %v2414_v42 = vsel %vm435_vm1, %v2402_v34, 128  ;;  %v2417_v45 = vsel %vm436_vm2, %v2402_v34, 128 }
 0x179   :  { %502 = vmin.xlane.f32.xlu0 %v2411_v52  ;;  %v513_v54 = vshra.s32 %v2414_v42, 16  ;;  %v527_v46 = vshra.s32 %v2417_v45, 16 }
 0x17a   :  { %v375_v47 = vpop.xlane.xlu1 %374  ;;  %v377_v48 = vpop.xlane.xlu0 %376 }
 0x17b   :  { %vm437_vm3 = vcmp.le.f32.partialorder %v2287_v1, %v375_v47  ;;  %vm438_vm4 = vcmp.le.f32.partialorder %v2290_v2, %v377_v48  ;;  %v2424_v59 = vcvt.s32.f32 %v513_v54  ;;  %v2426_v60 = vcvt.s32.f32 %v527_v46 }
 0x17c   :  { %v2429_v51 = vsel %vm437_vm3, %v2402_v34, 128  ;;  %v2432_v53 = vsel %vm438_vm4, %v2402_v34, 128 }
 0x17d   :  { %516 = vmin.xlane.f32.xlu1 %v2424_v59  ;;  %530 = vmin.xlane.f32.xlu0 %v2426_v60  ;;  %v541_v55 = vshra.s32 %v2429_v51, 16  ;;  %v555_v1 = vshra.s32 %v2432_v53, 16 }
 0x17e   :  { %v379_v56 = vpop.xlane.xlu1 %378  ;;  %v381_v2 = vpop.xlane.xlu0 %380 }
 0x17f   :  { %vm439_vm5 = vcmp.le.f32.partialorder %v2295_v7, %v379_v56  ;;  %vm440_vm6 = vcmp.le.f32.partialorder %v2298_v8, %v381_v2  ;;  %v2440_v61 = vcvt.s32.f32 %v541_v55  ;;  %v2442_v62 = vcvt.s32.f32 %v555_v1 }
 0x180   :  { %v2445_v63 = vsel %vm439_vm5, %v2402_v34, 128  ;;  %v2448_v0 = vsel %vm440_vm6, %v2402_v34, 128 }
 0x181   :  { %544 = vmin.xlane.f32.xlu1 %v2440_v61  ;;  %558 = vmin.xlane.f32.xlu0 %v2442_v62  ;;  %v569_v5 = vshra.s32 %v2445_v63, 16  ;;  %v583_v7 = vshra.s32 %v2448_v0, 16 }
 0x182   :  { %v383_v6 = vpop.xlane.xlu1 %382  ;;  %v385_v8 = vpop.xlane.xlu0 %384 }
 0x183   :  { %vm441_vm7 = vcmp.le.f32.partialorder %v2303_v13, %v383_v6  ;;  %vm442_vm8 = vcmp.le.f32.partialorder %v2306_v14, %v385_v8  ;;  %v2456_v9 = vcvt.s32.f32 %v569_v5  ;;  %v2458_v10 = vcvt.s32.f32 %v583_v7 }
 0x184   :  { %v2461_v15 = vsel %vm441_vm7, %v2402_v34, 128  ;;  %v2464_v16 = vsel %vm442_vm8, %v2402_v34, 128 }
 0x185   :  { %572 = vmin.xlane.f32.xlu1 %v2456_v9  ;;  %586 = vmin.xlane.f32.xlu0 %v2458_v10  ;;  %v597_v17 = vshra.s32 %v2461_v15, 16  ;;  %v611_v13 = vshra.s32 %v2464_v16, 16 }
 0x186   :  { %v387_v18 = vpop.xlane.xlu1 %386  ;;  %v389_v14 = vpop.xlane.xlu0 %388 }
 0x187   :  { %vm443_vm9 = vcmp.le.f32.partialorder %v2311_v19, %v387_v18  ;;  %vm444_vm10 = vcmp.le.f32.partialorder %v2314_v20, %v389_v14  ;;  %v2472_v23 = vcvt.s32.f32 %v597_v17  ;;  %v2474_v24 = vcvt.s32.f32 %v611_v13 }
 0x188   :  { %v2477_v27 = vsel %vm443_vm9, %v2402_v34, 128  ;;  %v2480_v33 = vsel %vm444_vm10, %v2402_v34, 128 }
 0x189   :  { %600 = vmin.xlane.f32.xlu1 %v2472_v23  ;;  %614 = vmin.xlane.f32.xlu0 %v2474_v24  ;;  %v625_v35 = vshra.s32 %v2477_v27, 16  ;;  %v639_v19 = vshra.s32 %v2480_v33, 16 }
 0x18a   :  { %v391_v39 = vpop.xlane.xlu1 %390  ;;  %v393_v20 = vpop.xlane.xlu0 %392 }
 0x18b   :  { %vm445_vm11 = vcmp.le.f32.partialorder %v2319_v25, %v391_v39  ;;  %vm446_vm12 = vcmp.le.f32.partialorder %v2322_v26, %v393_v20  ;;  %v2488_v40 = vcvt.s32.f32 %v625_v35  ;;  %v2490_v41 = vcvt.s32.f32 %v639_v19 }
 0x18c   :  { %v2493_v54 = vsel %vm445_vm11, %v2402_v34, 128  ;;  %v2496_v46 = vsel %vm446_vm12, %v2402_v34, 128 }
 0x18d   :  { %628 = vmin.xlane.f32.xlu1 %v2488_v40  ;;  %642 = vmin.xlane.f32.xlu0 %v2490_v41  ;;  %v653_v47 = vshra.s32 %v2493_v54, 16  ;;  %v667_v25 = vshra.s32 %v2496_v46, 16 }
 0x18e   :  { %v395_v48 = vpop.xlane.xlu1 %394  ;;  %v397_v26 = vpop.xlane.xlu0 %396 }
 0x18f   :  { %vm447_vm13 = vcmp.le.f32.partialorder %v2327_v31, %v395_v48  ;;  %vm448_vm14 = vcmp.le.f32.partialorder %v2330_v32, %v397_v26  ;;  %v2504_v55 = vcvt.s32.f32 %v653_v47  ;;  %v2506_v1 = vcvt.s32.f32 %v667_v25 }
 0x190   :  { %v2509_v56 = vsel %vm447_vm13, %v2402_v34, 128  ;;  %v2512_v2 = vsel %vm448_vm14, %v2402_v34, 128 }
 0x191   :  { %656 = vmin.xlane.f32.xlu1 %v2504_v55  ;;  %670 = vmin.xlane.f32.xlu0 %v2506_v1  ;;  %v681_v5 = vshra.s32 %v2509_v56, 16  ;;  %v695_v31 = vshra.s32 %v2512_v2, 16 }
 0x192   :  { %v399_v7 = vpop.xlane.xlu1 %398  ;;  %v401_v32 = vpop.xlane.xlu0 %400 }
 0x193   :  { %vm449_vm15 = vcmp.le.f32.partialorder %v2335_v37, %v399_v7  ;;  %vm450_vm0 = vcmp.le.f32.partialorder %v2338_v38, %v401_v32  ;;  %v2520_v6 = vcvt.s32.f32 %v681_v5  ;;  %v2522_v8 = vcvt.s32.f32 %v695_v31 }
 0x194   :  { %v2525_v17 = vsel %vm449_vm15, %v2402_v34, 128  ;;  %v2528_v13 = vsel %vm450_vm0, %v2402_v34, 128 }
 0x195   :  { %684 = vmin.xlane.f32.xlu1 %v2520_v6  ;;  %698 = vmin.xlane.f32.xlu0 %v2522_v8  ;;  %v709_v18 = vshra.s32 %v2525_v17, 16  ;;  %v723_v37 = vshra.s32 %v2528_v13, 16 }
 0x196   :  { %v403_v14 = vpop.xlane.xlu1 %402  ;;  %v405_v38 = vpop.xlane.xlu0 %404 }
 0x197   :  { %vm451_vm1 = vcmp.le.f32.partialorder %v2343_v43, %v403_v14  ;;  %vm452_vm2 = vcmp.le.f32.partialorder %v2346_v44, %v405_v38  ;;  %v2536_v35 = vcvt.s32.f32 %v709_v18  ;;  %v2538_v19 = vcvt.s32.f32 %v723_v37 }
 0x198   :  { %v2541_v39 = vsel %vm451_vm1, %v2402_v34, 128  ;;  %v2544_v20 = vsel %vm452_vm2, %v2402_v34, 128 }
 0x199   :  { %712 = vmin.xlane.f32.xlu1 %v2536_v35  ;;  %726 = vmin.xlane.f32.xlu0 %v2538_v19  ;;  %v737_v47 = vshra.s32 %v2541_v39, 16  ;;  %v751_v43 = vshra.s32 %v2544_v20, 16 }
 0x19a   :  { %v407_v25 = vpop.xlane.xlu1 %406  ;;  %v409_v44 = vpop.xlane.xlu0 %408 }
 0x19b   :  { %vm453_vm3 = vcmp.le.f32.partialorder %v2351_v49, %v407_v25  ;;  %vm454_vm4 = vcmp.le.f32.partialorder %v2354_v50, %v409_v44  ;;  %v2552_v48 = vcvt.s32.f32 %v737_v47  ;;  %v2554_v26 = vcvt.s32.f32 %v751_v43 }
 0x19c   :  { %v2557_v5 = vsel %vm453_vm3, %v2402_v34, 128  ;;  %v2560_v31 = vsel %vm454_vm4, %v2402_v34, 128 }
 0x19d   :  { %740 = vmin.xlane.f32.xlu1 %v2552_v48  ;;  %754 = vmin.xlane.f32.xlu0 %v2554_v26  ;;  %v765_v7 = vshra.s32 %v2557_v5, 16  ;;  %v779_v49 = vshra.s32 %v2560_v31, 16 }
 0x19e   :  { %v411_v32 = vpop.xlane.xlu1 %410  ;;  %v413_v50 = vpop.xlane.xlu0 %412 }
 0x19f   :  { %vm455_vm5 = vcmp.le.f32.partialorder %v2359_v57, %v411_v32  ;;  %vm456_vm6 = vcmp.le.f32.partialorder %v2362_v58, %v413_v50  ;;  %v2568_v18 = vcvt.s32.f32 %v765_v7  ;;  %v2570_v37 = vcvt.s32.f32 %v779_v49 }
 0x1a0   :  { %v2573_v14 = vsel %vm455_vm5, %v2402_v34, 128  ;;  %v2576_v38 = vsel %vm456_vm6, %v2402_v34, 128 }
 0x1a1   :  { %768 = vmin.xlane.f32.xlu1 %v2568_v18  ;;  %782 = vmin.xlane.f32.xlu0 %v2570_v37  ;;  %v793_v47 = vshra.s32 %v2573_v14, 16  ;;  %v807_v57 = vshra.s32 %v2576_v38, 16 }
 0x1a2   :  { %v415_v43 = vpop.xlane.xlu1 %414  ;;  %v417_v58 = vpop.xlane.xlu0 %416 }
 0x1a3   :  { %vm457_vm7 = vcmp.le.f32.partialorder %v2367_v3, %v415_v43  ;;  %vm458_vm8 = vcmp.le.f32.partialorder %v2370_v4, %v417_v58  ;;  %v2584_v25 = vcvt.s32.f32 %v793_v47  ;;  %v2586_v44 = vcvt.s32.f32 %v807_v57 }
 0x1a4   :  { %v2589_v7 = vsel %vm457_vm7, %v2402_v34, 128  ;;  %v2592_v49 = vsel %vm458_vm8, %v2402_v34, 128 }
 0x1a5   :  { %3345 = vst [vmem:[#allocation4_spill] sm:$0xff] %v2586_v44  ;;  %796 = vmin.xlane.f32.xlu1 %v2584_v25  ;;  %810 = vmin.xlane.f32.xlu0 %v2586_v44  ;;  %v821_v32 = vshra.s32 %v2589_v7, 16  ;;  %v835_v3 = vshra.s32 %v2592_v49, 16 }
 0x1a6   :  { %v419_v50 = vpop.xlane.xlu1 %418  ;;  %v421_v4 = vpop.xlane.xlu0 %420 }
 0x1a7   :  { %vm459_vm9 = vcmp.le.f32.partialorder %v2375_v11, %v419_v50  ;;  %vm460_vm10 = vcmp.le.f32.partialorder %v2378_v12, %v421_v4  ;;  %v2600_v47 = vcvt.s32.f32 %v821_v32  ;;  %v2602_v57 = vcvt.s32.f32 %v835_v3 }
 0x1a8   :  { %v2605_v43 = vsel %vm459_vm9, %v2402_v34, 128  ;;  %v2608_v58 = vsel %vm460_vm10, %v2402_v34, 128 }
 0x1a9   :  { %3346 = vst [vmem:[#allocation5_spill] sm:$0xff] %v2600_v47  ;;  %3347 = vst [vmem:[#allocation6_spill] sm:$0xff] %v2602_v57  ;;  %824 = vmin.xlane.f32.xlu1 %v2600_v47  ;;  %838 = vmin.xlane.f32.xlu0 %v2602_v57  ;;  %v849_v44 = vshra.s32 %v2605_v43, 16  ;;  %v863_v11 = vshra.s32 %v2608_v58, 16 }
 0x1aa   :  { %v423_v50 = vpop.xlane.xlu1 %422  ;;  %v425_v12 = vpop.xlane.xlu0 %424 }
 0x1ab   :  { %vm461_vm11 = vcmp.le.f32.partialorder %v2383_v21, %v423_v50  ;;  %vm462_vm12 = vcmp.le.f32.partialorder %v2386_v22, %v425_v12  ;;  %v2616_v32 = vcvt.s32.f32 %v849_v44  ;;  %v2618_v3 = vcvt.s32.f32 %v863_v11 }
 0x1ac   :  { %v2621_v4 = vsel %vm461_vm11, %v2402_v34, 128  ;;  %v2624_v47 = vsel %vm462_vm12, %v2402_v34, 128 }
 0x1ad   :  { %3348 = vst [vmem:[#allocation7_spill] sm:$0xff] %v2616_v32  ;;  %3349 = vst [vmem:[#allocation8_spill] sm:$0xff] %v2618_v3  ;;  %852 = vmin.xlane.f32.xlu1 %v2616_v32  ;;  %866 = vmin.xlane.f32.xlu0 %v2618_v3  ;;  %v877_v57 = vshra.s32 %v2621_v4, 16  ;;  %v891_v21 = vshra.s32 %v2624_v47, 16 }
 0x1ae   :  { %v427_v50 = vpop.xlane.xlu1 %426  ;;  %v429_v22 = vpop.xlane.xlu0 %428 }
 0x1af   :  { %vm463_vm13 = vcmp.le.f32.partialorder %v2391_v28, %v427_v50  ;;  %vm464_vm14 = vcmp.le.f32.partialorder %v2394_v29, %v429_v22  ;;  %v2632_v44 = vcvt.s32.f32 %v877_v57  ;;  %v2634_v11 = vcvt.s32.f32 %v891_v21 }
 0x1b0   :  { %v2637_v12 = vsel %vm463_vm13, %v2402_v34, 128  ;;  %v2640_v32 = vsel %vm464_vm14, %v2402_v34, 128 }
 0x1b1   :  { %3350 = vst [vmem:[#allocation9_spill] sm:$0xff] %v2634_v11  ;;  %880 = vmin.xlane.f32.xlu1 %v2632_v44  ;;  %894 = vmin.xlane.f32.xlu0 %v2634_v11  ;;  %v905_v3 = vshra.s32 %v2637_v12, 16  ;;  %v919_v28 = vshra.s32 %v2640_v32, 16 }
 0x1b2   :  { %v431_v50 = vpop.xlane.xlu1 %430 }
 0x1b3   :  { %vm465_vm15 = vcmp.le.f32.partialorder %v2399_v30, %v431_v50  ;;  %v2647_v29 = vcvt.s32.f32 %v905_v3  ;;  %v2649_v57 = vcvt.s32.f32 %v919_v28  ;;  %v1253_v30 = vld [vmem:[%s3327_s3 + $0x78] sm:$0xff]  ;;  %v1252_v3 = vld [vmem:[%s3327_s3 + $0x70] sm:$0xff]  ;;  %v1251_v28 = vld [vmem:[%s3327_s3 + $0x68] sm:$0xff] }
 0x1b4   :  { %v2652_v21 = vsel %vm465_vm15, %v2402_v34, 128  ;;  %1969 = vmatprep.subr.mxu1 %v1253_v30  ;;  %v1250_v50 = vld [vmem:[%s3327_s3 + $0x60] sm:$0xff]  ;;  %v512_v34 = vand.u32 65535, %v2414_v42 }
 0x1b5   :  { %3351 = vst [vmem:[#allocation10_spill] sm:$0xff] %v2647_v29  ;;  %3352 = vst [vmem:[#allocation11_spill] sm:$0xff] %v2649_v57  ;;  %908 = vmin.xlane.f32.xlu1 %v2647_v29  ;;  %922 = vmin.xlane.f32.xlu0 %v2649_v57  ;;  %v933_v22 = vshra.s32 %v2652_v21, 16  ;;  %v540_v29 = vand.u32 65535, %v2429_v51  ;;  %v568_v51 = vand.u32 65535, %v2445_v63  ;;  %v596_v63 = vand.u32 65535, %v2461_v15 }
 0x1b6   :  { %3353 = vst [vmem:[#allocation12_spill] sm:$0xff] %v2652_v21  ;;  %1970 = vmatpush3.msra.mxu1 %v1253_v30  ;;  %v1248_v30 = vld [vmem:[%s3327_s3 + $0x50] sm:$0xff] }
 0x1b7   :  { %v2657_v11 = vcvt.s32.f32 %v933_v22  ;;  %1971 = vmatprep.subr.mxu1 %v1252_v3  ;;  %v1249_v22 = vld [vmem:[%s3327_s3 + $0x58] sm:$0xff] }
 0x1b8   :  { %1972 = vmatpush3.msra.mxu1 %v1252_v3  ;;  %v1247_v3 = vld [vmem:[%s3327_s3 + $0x48] sm:$0xff] }
 0x1b9   :  { %3354 = vst [vmem:[#allocation13_spill] sm:$0xff] %v2657_v11  ;;  %936 = vmin.xlane.f32.xlu1 %v2657_v11  ;;  %1973 = vmatprep.subr.mxu1 %v1251_v28 }
 0x1ba   :  { %1974 = vmatpush3.msra.mxu1 %v1251_v28  ;;  %v1246_v28 = vld [vmem:[%s3327_s3 + $0x40] sm:$0xff] }
 0x1bb   :  { %1975 = vmatprep.subr.mxu1 %v1250_v50 }
 0x1bc   :  { %1976 = vmatpush3.msra.mxu1 %v1250_v50  ;;  %v1245_v50 = vld [vmem:[%s3327_s3 + $0x38] sm:$0xff] }
 0x1bd   :  { %1977 = vmatprep.subr.mxu1 %v1249_v22 }
 0x1be   :  { %1978 = vmatpush3.msra.mxu1 %v1249_v22  ;;  %v1244_v22 = vld [vmem:[%s3327_s3 + $0x30] sm:$0xff] }
 0x1bf   :  { %1979 = vmatprep.subr.mxu1 %v1248_v30 }
 0x1c0   :  { %1980 = vmatpush3.msra.mxu1 %v1248_v30  ;;  %v1243_v30 = vld [vmem:[%s3327_s3 + $0x28] sm:$0xff] }
 0x1c1   :  { %1981 = vmatprep.subr.mxu1 %v1247_v3 }
 0x1c2   :  { %1982 = vmatpush3.msra.mxu1 %v1247_v3  ;;  %v1242_v3 = vld [vmem:[%s3327_s3 + $0x20] sm:$0xff] }
 0x1c3   :  { %1983 = vmatprep.subr.mxu1 %v1246_v28 }
 0x1c4   :  { %1984 = vmatpush3.msra.mxu1 %v1246_v28  ;;  %v498_v28 = vand.u32 65535, %v2406_v36  ;;  %v514_v36 = vcvt.s32.f32 %v512_v34  ;;  %v542_v34 = vcvt.s32.f32 %v540_v29  ;;  %v570_v29 = vcvt.s32.f32 %v568_v51 }
 0x1c5   :  { %1985 = vmatprep.subr.mxu1 %v1245_v50 }
 0x1c6   :  { %1986 = vmatpush3.msra.mxu1 %v1245_v50  ;;  %v526_v50 = vand.u32 65535, %v2417_v45  ;;  %v500_v57 = vcvt.s32.f32 %v498_v28 }
 0x1c7   :  { %1987 = vmatprep.subr.mxu1 %v1244_v22 }
 0x1c8   :  { %1988 = vmatpush3.msra.mxu1 %v1244_v22  ;;  %v528_v42 = vcvt.s32.f32 %v526_v50 }
 0x1c9   :  { %1989 = vmatprep.subr.mxu1 %v1243_v30 }
 0x1ca   :  { %1990 = vmatpush3.msra.mxu1 %v1243_v30  ;;  %v554_v30 = vand.u32 65535, %v2432_v53  ;;  %v582_v53 = vand.u32 65535, %v2448_v0  ;;  %v610_v0 = vand.u32 65535, %v2464_v16  ;;  %v1240_v16 = vld [vmem:[%s3327_s3 + $0x10] sm:$0xff] }
 0x1cb   :  { %1991 = vmatprep.subr.mxu1 %v1242_v3 }
 0x1cc   :  { %1992 = vmatpush3.msra.mxu1 %v1242_v3  ;;  %v556_v50 = vcvt.s32.f32 %v554_v30  ;;  %v584_v30 = vcvt.s32.f32 %v582_v53  ;;  %v612_v51 = vcvt.s32.f32 %v610_v0  ;;  %v680_v0 = vand.u32 65535, %v2509_v56 }
 0x1cd   :  { %v708_v56 = vand.u32 65535, %v2525_v17  ;;  %v736_v17 = vand.u32 65535, %v2541_v39  ;;  %v764_v39 = vand.u32 65535, %v2557_v5  ;;  %v792_v5 = vand.u32 65535, %v2573_v14 }
 0x1ce   :  { %v820_v14 = vand.u32 65535, %v2589_v7  ;;  %v848_v7 = vand.u32 65535, %v2605_v43  ;;  %v876_v43 = vand.u32 65535, %v2621_v4  ;;  %v904_v4 = vand.u32 65535, %v2637_v12 }
 0x202   :  { %v2699_v11 = vpop.xlane.xlu0 %502 }
 0x203   :  { %vm504_vm0 = vcmp.eq.f32.partialorder %v2411_v52, %v2699_v11 }
 0x204   :  { %v505_v22 = vsel %vm504_vm0, %v500_v57, inf }
 0x205   :  { %506 = vmin.xlane.f32.xlu0 %v505_v22 }
 0x206   :  { %v2705_v21 = vpop.xlane.xlu1 %516  ;;  %v2707_v3 = vpop.xlane.xlu0 %530 }
 0x207   :  { %vm518_vm1 = vcmp.eq.f32.partialorder %v2424_v59, %v2705_v21  ;;  %vm532_vm2 = vcmp.eq.f32.partialorder %v2426_v60, %v2707_v3 }
 0x208   :  { %v519_v45 = vsel %vm518_vm1, %v514_v36, inf  ;;  %v533_v52 = vsel %vm532_vm2, %v528_v42, inf  ;;  %v624_v42 = vand.u32 65535, %v2477_v27  ;;  %v1239_v27 = vld [vmem:[%s3327_s3 + $0x8] sm:$0xff] }
 0x209   :  { %520 = vmin.xlane.f32.xlu1 %v519_v45  ;;  %534 = vmin.xlane.f32.xlu0 %v533_v52  ;;  %v598_v52 = vcvt.s32.f32 %v596_v63  ;;  %v1238_v63 = vld [vmem:[%s3327_s3] sm:$0xff] }
 0x20a   :  { %v2715_v57 = vpop.xlane.xlu1 %544  ;;  %v2717_v28 = vpop.xlane.xlu0 %558 }
 0x20b   :  { %vm546_vm3 = vcmp.eq.f32.partialorder %v2440_v61, %v2715_v57  ;;  %vm560_vm4 = vcmp.eq.f32.partialorder %v2442_v62, %v2717_v28  ;;  %v1241_v61 = vld [vmem:[%s3327_s3 + $0x18] sm:$0xff] }
 0x20c   :  { %v547_v59 = vsel %vm546_vm3, %v542_v34, inf  ;;  %v561_v60 = vsel %vm560_vm4, %v556_v50, inf  ;;  %1993 = vmatprep.subr.mxu1 %v1241_v61  ;;  %v666_v50 = vand.u32 65535, %v2496_v46 }
 0x20d   :  { %548 = vmin.xlane.f32.xlu1 %v547_v59  ;;  %562 = vmin.xlane.f32.xlu0 %v561_v60  ;;  %v626_v60 = vcvt.s32.f32 %v624_v42 }
 0x20e   :  { %v2725_v22 = vpop.xlane.xlu1 %572  ;;  %v2727_v36 = vpop.xlane.xlu0 %586  ;;  %1994 = vmatpush3.msra.mxu1 %v1241_v61 }
 0x20f   :  { %vm574_vm5 = vcmp.eq.f32.partialorder %v2456_v9, %v2725_v22  ;;  %vm588_vm6 = vcmp.eq.f32.partialorder %v2458_v10, %v2727_v36  ;;  %v638_v9 = vand.u32 65535, %v2480_v33  ;;  %1995 = vmatprep.subr.mxu1 %v1240_v16  ;;  %v652_v33 = vand.u32 65535, %v2493_v54 }
 0x210   :  { %v575_v62 = vsel %vm574_vm5, %v570_v29, inf  ;;  %v589_v15 = vsel %vm588_vm6, %v584_v30, inf  ;;  %1996 = vmatpush3.msra.mxu1 %v1240_v16  ;;  %v694_v29 = vand.u32 65535, %v2512_v2  ;;  %v722_v2 = vand.u32 65535, %v2528_v13 }
 0x211   :  { %576 = vmin.xlane.f32.xlu1 %v575_v62  ;;  %590 = vmin.xlane.f32.xlu0 %v589_v15  ;;  %v654_v62 = vcvt.s32.f32 %v652_v33  ;;  %v668_v15 = vcvt.s32.f32 %v666_v50  ;;  %v750_v13 = vand.u32 65535, %v2544_v20  ;;  %v778_v20 = vand.u32 65535, %v2560_v31 }
 0x212   :  { %v2741_v45 = vpop.xlane.xlu1 %600  ;;  %v2743_v10 = vpop.xlane.xlu0 %614  ;;  %1997 = vmatprep.subr.mxu1 %v1239_v27  ;;  %v806_v31 = vand.u32 65535, %v2576_v38  ;;  %v834_v38 = vand.u32 65535, %v2592_v49  ;;  %v862_v49 = vand.u32 65535, %v2608_v58  ;;  %v890_v58 = vand.u32 65535, %v2624_v47 }
 0x213   :  { %vm602_vm7 = vcmp.eq.f32.partialorder %v2472_v23, %v2741_v45  ;;  %vm616_vm8 = vcmp.eq.f32.partialorder %v2474_v24, %v2743_v10  ;;  %v640_v24 = vcvt.s32.f32 %v638_v9  ;;  %1998 = vmatpush3.msra.mxu1 %v1239_v27  ;;  %v682_v9 = vcvt.s32.f32 %v680_v0 }
 0x214   :  { %v603_v53 = vsel %vm602_vm7, %v598_v52, inf  ;;  %v617_v34 = vsel %vm616_vm8, %v612_v51, inf  ;;  %1999 = vmatprep.subr.mxu1 %v1238_v63  ;;  %v696_v52 = vcvt.s32.f32 %v694_v29  ;;  %v724_v27 = vcvt.s32.f32 %v722_v2 }
 0x215   :  { %604 = vmin.xlane.f32.xlu1 %v603_v53  ;;  %618 = vmin.xlane.f32.xlu0 %v617_v34  ;;  %v710_v34 = vcvt.s32.f32 %v708_v56  ;;  %v780_v0 = vcvt.s32.f32 %v778_v20  ;;  %v918_v47 = vand.u32 65535, %v2640_v32 }
 0x216   :  { %v2754_v59 = vpop.xlane.xlu1 %628  ;;  %v2756_v23 = vpop.xlane.xlu0 %642  ;;  %2000 = vmatpush3.msra.mxu1 %v1238_v63 }
 0x217   :  { %vm630_vm9 = vcmp.eq.f32.partialorder %v2488_v40, %v2754_v59  ;;  %vm644_vm10 = vcmp.eq.f32.partialorder %v2490_v41, %v2756_v23 }
 0x218   :  { %v631_v54 = vsel %vm630_vm9, %v626_v60, inf  ;;  %v645_v46 = vsel %vm644_vm10, %v640_v24, inf  ;;  %v738_v60 = vcvt.s32.f32 %v736_v17  ;;  %v752_v24 = vcvt.s32.f32 %v750_v13 }
 0x219   :  { %632 = vmin.xlane.f32.xlu1 %v631_v54  ;;  %646 = vmin.xlane.f32.xlu0 %v645_v46  ;;  %v766_v46 = vcvt.s32.f32 %v764_v39  ;;  %v3359_v39 = vld [vmem:[#allocation8_spill] sm:$0xff] }
 0x21a   :  { %v2767_v30 = vpop.xlane.xlu1 %656  ;;  %v2769_v61 = vpop.xlane.xlu0 %670 }
 0x21b   :  { %vm658_vm11 = vcmp.eq.f32.partialorder %v2504_v55, %v2767_v30  ;;  %vm672_vm12 = vcmp.eq.f32.partialorder %v2506_v1, %v2769_v61 }
 0x21c   :  { %v659_v40 = vsel %vm658_vm11, %v654_v62, inf  ;;  %v673_v41 = vsel %vm672_vm12, %v668_v15, inf  ;;  %v794_v15 = vcvt.s32.f32 %v792_v5  ;;  %v892_v5 = vcvt.s32.f32 %v890_v58 }
 0x21d   :  { %660 = vmin.xlane.f32.xlu1 %v659_v40  ;;  %674 = vmin.xlane.f32.xlu0 %v673_v41  ;;  %v808_v40 = vcvt.s32.f32 %v806_v31  ;;  %v3360_v31 = vld [vmem:[#allocation9_spill] sm:$0xff] }
 0x21e   :  { %v2777_v16 = vpop.xlane.xlu1 %684  ;;  %v2779_v42 = vpop.xlane.xlu0 %698 }
 0x21f   :  { %vm686_vm13 = vcmp.eq.f32.partialorder %v2520_v6, %v2777_v16  ;;  %vm700_vm14 = vcmp.eq.f32.partialorder %v2522_v8, %v2779_v42 }
 0x220   :  { %v687_v55 = vsel %vm686_vm13, %v682_v9, inf  ;;  %v701_v1 = vsel %vm700_vm14, %v696_v52, inf  ;;  %v822_v9 = vcvt.s32.f32 %v820_v14  ;;  %v836_v52 = vcvt.s32.f32 %v834_v38 }
 0x221   :  { %688 = vmin.xlane.f32.xlu1 %v687_v55  ;;  %702 = vmin.xlane.f32.xlu0 %v701_v1  ;;  %v3356_v55 = vld [vmem:[#allocation5_spill] sm:$0xff]  ;;  %v906_v14 = vcvt.s32.f32 %v904_v4  ;;  %v920_v38 = vcvt.s32.f32 %v918_v47 }
 0x222   :  { %v2787_v51 = vpop.xlane.xlu1 %712  ;;  %v2789_v53 = vpop.xlane.xlu0 %726 }
 0x223   :  { %vm714_vm15 = vcmp.eq.f32.partialorder %v2536_v35, %v2787_v51  ;;  %vm728_vm0 = vcmp.eq.f32.partialorder %v2538_v19, %v2789_v53 }
 0x224   :  { %v715_v6 = vsel %vm714_vm15, %v710_v34, inf  ;;  %v729_v8 = vsel %vm728_vm0, %v724_v27, inf  ;;  %v850_v27 = vcvt.s32.f32 %v848_v7  ;;  %v3364_v7 = vld [vmem:[#allocation13_spill] sm:$0xff]  ;;  %vm946_vm0 = vcmask 7168  }
 0x225   :  { %716 = vmin.xlane.f32.xlu1 %v715_v6  ;;  %730 = vmin.xlane.f32.xlu0 %v729_v8  ;;  %v864_v6 = vcvt.s32.f32 %v862_v49  ;;  %v3358_v8 = vld [vmem:[#allocation7_spill] sm:$0xff] }
 0x226   :  { %v2797_v33 = vpop.xlane.xlu1 %740  ;;  %v2799_v50 = vpop.xlane.xlu0 %754 }
 0x227   :  { %vm742_vm1 = vcmp.eq.f32.partialorder %v2552_v48, %v2797_v33  ;;  %vm756_vm2 = vcmp.eq.f32.partialorder %v2554_v26, %v2799_v50 }
 0x228   :  { %v743_v35 = vsel %vm742_vm1, %v738_v60, inf  ;;  %v757_v19 = vsel %vm756_vm2, %v752_v24, inf }
 0x229   :  { %744 = vmin.xlane.f32.xlu1 %v743_v35  ;;  %758 = vmin.xlane.f32.xlu0 %v757_v19  ;;  %v878_v19 = vcvt.s32.f32 %v876_v43 }
 0x22a   :  { %v2807_v63 = vpop.xlane.xlu1 %768  ;;  %v2809_v54 = vpop.xlane.xlu0 %782 }
 0x22b   :  { %vm770_vm3 = vcmp.eq.f32.partialorder %v2568_v18, %v2807_v63  ;;  %vm784_vm4 = vcmp.eq.f32.partialorder %v2570_v37, %v2809_v54  ;;  %v3355_v18 = vld [vmem:[#allocation4_spill] sm:$0xff] }
 0x22c   :  { %v771_v48 = vsel %vm770_vm3, %v766_v46, inf  ;;  %v785_v26 = vsel %vm784_vm4, %v780_v0, inf }
 0x22d   :  { %772 = vmin.xlane.f32.xlu1 %v771_v48  ;;  %786 = vmin.xlane.f32.xlu0 %v785_v26  ;;  %v3361_v48 = vld [vmem:[#allocation12_spill] sm:$0xff] }
 0x22e   :  { %v2817_v29 = vpop.xlane.xlu1 %796  ;;  %v2819_v62 = vpop.xlane.xlu0 %810  ;;  %v932_v12 = vand.u32 65535, %v3361_v48 }
 0x22f   :  { %vm798_vm5 = vcmp.eq.f32.partialorder %v2584_v25, %v2817_v29  ;;  %vm812_vm6 = vcmp.eq.f32.partialorder %v3355_v18, %v2819_v62  ;;  %v3357_v25 = vld [vmem:[#allocation6_spill] sm:$0xff] }
 0x230   :  { %v799_v37 = vsel %vm798_vm5, %v794_v15, inf  ;;  %v813_v41 = vsel %vm812_vm6, %v808_v40, inf  ;;  %v3362_v15 = vld [vmem:[#allocation10_spill] sm:$0xff] }
 0x231   :  { %800 = vmin.xlane.f32.xlu1 %v799_v37  ;;  %814 = vmin.xlane.f32.xlu0 %v813_v41  ;;  %v934_v41 = vcvt.s32.f32 %v932_v12 }
 0x232   :  { %v2827_v56 = vpop.xlane.xlu1 %824  ;;  %v2829_v2 = vpop.xlane.xlu0 %838 }
 0x233   :  { %vm826_vm7 = vcmp.eq.f32.partialorder %v3356_v55, %v2827_v56  ;;  %vm840_vm8 = vcmp.eq.f32.partialorder %v3357_v25, %v2829_v2 }
 0x234   :  { %v827_v1 = vsel %vm826_vm7, %v822_v9, inf  ;;  %v841_v17 = vsel %vm840_vm8, %v836_v52, inf  ;;  %v509_v9 = vcvt.f32.s32 %v2699_v11  ;;  %v523_v52 = vcvt.f32.s32 %v2705_v21  ;;  %v3365_v11 = vld [vmem:[#allocation3_spill] sm:$0xff] }
 0x235   :  { %828 = vmin.xlane.f32.xlu1 %v827_v1  ;;  %842 = vmin.xlane.f32.xlu0 %v841_v17  ;;  %v537_v1 = vcvt.f32.s32 %v2707_v3  ;;  %v2084_v21 = vmov 1.0  }
 0x236   :  { %v2837_v13 = vpop.xlane.xlu1 %852  ;;  %v2839_v34 = vpop.xlane.xlu0 %866  ;;  %v510_v25 = vshll.u32 %v509_v9, 16  ;;  %v524_v58 = vshll.u32 %v523_v52, 16  ;;  %v635_v9 = vcvt.f32.s32 %v2754_v59  ;;  %v649_v52 = vcvt.f32.s32 %v2756_v23 }
 0x237   :  { %vm854_vm9 = vcmp.eq.f32.partialorder %v3358_v8, %v2837_v13  ;;  %vm868_vm10 = vcmp.eq.f32.partialorder %v3359_v39, %v2839_v34 }
 0x238   :  { %v855_v20 = vsel %vm854_vm9, %v850_v27, inf  ;;  %v869_v60 = vsel %vm868_vm10, %v864_v6, inf  ;;  %v551_v27 = vcvt.f32.s32 %v2715_v57  ;;  %v565_v6 = vcvt.f32.s32 %v2717_v28 }
 0x239   :  { %856 = vmin.xlane.f32.xlu1 %v855_v20  ;;  %870 = vmin.xlane.f32.xlu0 %v869_v60  ;;  %v538_v20 = vshll.u32 %v537_v1, 16  ;;  %v579_v28 = vcvt.f32.s32 %v2725_v22 }
 0x23a   :  { %v2847_v24 = vpop.xlane.xlu1 %880  ;;  %v2849_v35 = vpop.xlane.xlu0 %894  ;;  %v552_v57 = vshll.u32 %v551_v27, 16  ;;  %v663_v27 = vcvt.f32.s32 %v2767_v30 }
 0x23b   :  { %vm882_vm11 = vcmp.eq.f32.partialorder %v2632_v44, %v2847_v24  ;;  %vm896_vm12 = vcmp.eq.f32.partialorder %v3360_v31, %v2849_v35  ;;  %v3363_v44 = vld [vmem:[#allocation11_spill] sm:$0xff]  ;;  %v580_v12 = vshll.u32 %v579_v28, 16 }
 0x23c   :  { %v883_v46 = vsel %vm882_vm11, %v878_v19, inf  ;;  %v897_v0 = vsel %vm896_vm12, %v892_v5, inf  ;;  %v566_v19 = vshll.u32 %v565_v6, 16  ;;  %v593_v5 = vcvt.f32.s32 %v2727_v36 }
 0x23d   :  { %884 = vmin.xlane.f32.xlu1 %v883_v46  ;;  %898 = vmin.xlane.f32.xlu0 %v897_v0  ;;  %v677_v6 = vcvt.f32.s32 %v2769_v61 }
 0x23e   :  { %v2856_v26 = vpop.xlane.xlu1 %908  ;;  %v2858_v32 = vpop.xlane.xlu0 %922 }
 0x23f   :  { %vm910_vm13 = vcmp.eq.f32.partialorder %v3362_v15, %v2856_v26  ;;  %vm924_vm14 = vcmp.eq.f32.partialorder %v3363_v44, %v2858_v32  ;;  %v621_v15 = vcvt.f32.s32 %v2743_v10 }
 0x240   :  { %v911_v40 = vsel %vm910_vm13, %v906_v14, inf  ;;  %v925_v18 = vsel %vm924_vm14, %v920_v38, inf  ;;  %v594_v14 = vshll.u32 %v593_v5, 16  ;;  %v607_v38 = vcvt.f32.s32 %v2741_v45 }
 0x241   :  { %912 = vmin.xlane.f32.xlu1 %v911_v40  ;;  %926 = vmin.xlane.f32.xlu0 %v925_v18 }
 0x242   :  { %v2864_v37 = vpop.xlane.xlu1 %936 }
 0x243   :  { %vm938_vm15 = vcmp.eq.f32.partialorder %v3364_v7, %v2864_v37  ;;  %v608_v7 = vshll.u32 %v607_v38, 16 }
 0x244   :  { %v939_v49 = vsel %vm938_vm15, %v934_v41, inf }
 0x245   :  { %940 = vmin.xlane.f32.xlu1 %v939_v49  ;;  %v622_v49 = vshll.u32 %v621_v15, 16 }
 0x28e   :  { %v507_v55 = vpop.xlane.xlu0 %506 }
 0x28f   :  { %v508_v17 = vcvt.f32.s32 %v507_v55 }
 0x291   :  { %v511_v43 = vadd.s32 %v510_v25, %v508_v17 }
 0x292   :  { %v521_v8 = vpop.xlane.xlu1 %520  ;;  %v535_v39 = vpop.xlane.xlu0 %534 }
 0x293   :  { %v522_v60 = vcvt.f32.s32 %v521_v8  ;;  %v536_v4 = vcvt.f32.s32 %v535_v39  ;;  %947 = vst.msk [vmem:[%s3328_s6] sm:$0xff] %vm946_vm0, %v511_v43  ;;  %vm1142_vm1 = vcmp.eq.s32.totalorder %v3365_v11, %v511_v43  ;;  %v636_v43 = vshll.u32 %v635_v9, 16 }
 0x294   :  { %2001 = vmatprep.mubr.msk.f32.mxu1 %vm1142_vm1, %v2084_v21 }
 0x295   :  { %v525_v3 = vadd.s32 %v524_v58, %v522_v60  ;;  %v539_v47 = vadd.s32 %v538_v20, %v536_v4  ;;  %v650_v58 = vshll.u32 %v649_v52, 16  ;;  %v664_v4 = vshll.u32 %v663_v27, 16 }
 0x296   :  { %v549_v31 = vpop.xlane.xlu1 %548  ;;  %v563_v46 = vpop.xlane.xlu0 %562  ;;  %v775_v52 = vcvt.f32.s32 %v2807_v63  ;;  %v817_v27 = vcvt.f32.s32 %v2819_v62 }
 0x297   :  { %948 = vst.msk [vmem:[%s3328_s6 + $0x8] sm:$0xff] %vm946_vm0, %v525_v3  ;;  %949 = vst.msk [vmem:[%s3328_s6 + $0x10] sm:$0xff] %vm946_vm0, %v539_v47  ;;  %v550_v0 = vcvt.f32.s32 %v549_v31  ;;  %v564_v48 = vcvt.f32.s32 %v563_v46  ;;  %vm1143_vm2 = vcmp.eq.s32.totalorder %v3365_v11, %v525_v3  ;;  %vm1144_vm3 = vcmp.eq.s32.totalorder %v3365_v11, %v539_v47 }
 0x298   :  { %2002 = vmatmul.mubr.msk.f32.vlgmr.msra.gmra.mxu1 %vm1143_vm2, %v2084_v21  ;;  %v678_v3 = vshll.u32 %v677_v6, 16  ;;  %v691_v47 = vcvt.f32.s32 %v2777_v16 }
 0x299   :  { %v553_v22 = vadd.s32 %v552_v57, %v550_v0  ;;  %v567_v36 = vadd.s32 %v566_v19, %v564_v48  ;;  %2004 = vmatprep.mubr.msk.f32.mxu1 %vm1144_vm3, %v2084_v21  ;;  %v705_v57 = vcvt.f32.s32 %v2779_v42  ;;  %v719_v48 = vcvt.f32.s32 %v2787_v51 }
 0x29a   :  { %v577_v44 = vpop.xlane.xlu1 %576  ;;  %v591_v40 = vpop.xlane.xlu0 %590  ;;  %v692_v46 = vshll.u32 %v691_v47, 16 }
 0x29b   :  { %950 = vst.msk [vmem:[%s3328_s6 + $0x18] sm:$0xff] %vm946_vm0, %v553_v22  ;;  %951 = vst.msk [vmem:[%s3328_s6 + $0x20] sm:$0xff] %vm946_vm0, %v567_v36  ;;  %v578_v18 = vcvt.f32.s32 %v577_v44  ;;  %v592_v41 = vcvt.f32.s32 %v591_v40  ;;  %vm1145_vm4 = vcmp.eq.s32.totalorder %v3365_v11, %v553_v22  ;;  %vm1146_vm5 = vcmp.eq.s32.totalorder %v3365_v11, %v567_v36 }
 0x29c   :  { %2005 = vmatmul.mubr.msk.f32.gmra.mxu1 %vm1145_vm4, %v2084_v21  ;;  %v706_v0 = vshll.u32 %v705_v57, 16  ;;  %v733_v22 = vcvt.f32.s32 %v2789_v53  ;;  %v720_v15 = vshll.u32 %v719_v48, 16  ;;  %v747_v40 = vcvt.f32.s32 %v2797_v33 }
 0x29d   :  { %v581_v45 = vadd.s32 %v580_v12, %v578_v18  ;;  %v595_v10 = vadd.s32 %v594_v14, %v592_v41  ;;  %2007 = vmatprep.mubr.msk.f32.mxu1 %vm1146_vm5, %v2084_v21  ;;  %v761_v18 = vcvt.f32.s32 %v2799_v50 }
 0x29e   :  { %v605_v55 = vpop.xlane.xlu1 %604  ;;  %v619_v25 = vpop.xlane.xlu0 %618  ;;  %v734_v44 = vshll.u32 %v733_v22, 16 }
 0x29f   :  { %952 = vst.msk [vmem:[%s3328_s6 + $0x28] sm:$0xff] %vm946_vm0, %v581_v45  ;;  %953 = vst.msk [vmem:[%s3328_s6 + $0x30] sm:$0xff] %vm946_vm0, %v595_v10  ;;  %v606_v1 = vcvt.f32.s32 %v605_v55  ;;  %v620_v17 = vcvt.f32.s32 %v619_v25  ;;  %vm1147_vm6 = vcmp.eq.s32.totalorder %v3365_v11, %v581_v45  ;;  %vm1148_vm7 = vcmp.eq.s32.totalorder %v3365_v11, %v595_v10 }
 0x2a0   :  { %2008 = vmatmul.mubr.msk.f32.gmra.mxu1 %vm1147_vm6, %v2084_v21  ;;  %v762_v9 = vshll.u32 %v761_v18, 16  ;;  %v789_v55 = vcvt.f32.s32 %v2809_v54  ;;  %v915_v18 = vcvt.f32.s32 %v2856_v26 }
 0x2a1   :  { %v609_v59 = vadd.s32 %v608_v7, %v606_v1  ;;  %v623_v23 = vadd.s32 %v622_v49, %v620_v17  ;;  %2010 = vmatprep.mubr.msk.f32.mxu1 %vm1148_vm7, %v2084_v21  ;;  %v748_v49 = vshll.u32 %v747_v40, 16 }
 0x2a2   :  { %v633_v8 = vpop.xlane.xlu1 %632  ;;  %v647_v39 = vpop.xlane.xlu0 %646 }
 0x2a3   :  { %954 = vst.msk [vmem:[%s3328_s6 + $0x38] sm:$0xff] %vm946_vm0, %v609_v59  ;;  %955 = vst.msk [vmem:[%s3328_s6 + $0x40] sm:$0xff] %vm946_vm0, %v623_v23  ;;  %v634_v20 = vcvt.f32.s32 %v633_v8  ;;  %v648_v60 = vcvt.f32.s32 %v647_v39  ;;  %vm1149_vm8 = vcmp.eq.s32.totalorder %v3365_v11, %v609_v59  ;;  %vm1150_vm9 = vcmp.eq.s32.totalorder %v3365_v11, %v623_v23 }
 0x2a4   :  { %2011 = vmatmul.mubr.msk.f32.gmra.mxu1 %vm1149_vm8, %v2084_v21  ;;  %v776_v23 = vshll.u32 %v775_v52, 16 }
 0x2a5   :  { %v637_v30 = vadd.s32 %v636_v43, %v634_v20  ;;  %v651_v61 = vadd.s32 %v650_v58, %v648_v60  ;;  %2013 = vmatprep.mubr.msk.f32.mxu1 %vm1150_vm9, %v2084_v21  ;;  %v790_v43 = vshll.u32 %v789_v55, 16  ;;  %v803_v58 = vcvt.f32.s32 %v2817_v29 }
 0x2a6   :  { %v661_v19 = vpop.xlane.xlu1 %660  ;;  %v675_v28 = vpop.xlane.xlu0 %674 }
 0x2a7   :  { %956 = vst.msk [vmem:[%s3328_s6 + $0x48] sm:$0xff] %vm946_vm0, %v637_v30  ;;  %957 = vst.msk [vmem:[%s3328_s6 + $0x50] sm:$0xff] %vm946_vm0, %v651_v61  ;;  %v662_v5 = vcvt.f32.s32 %v661_v19  ;;  %v676_v31 = vcvt.f32.s32 %v675_v28  ;;  %vm1151_vm10 = vcmp.eq.s32.totalorder %v3365_v11, %v637_v30  ;;  %vm1152_vm11 = vcmp.eq.s32.totalorder %v3365_v11, %v651_v61 }
 0x2a8   :  { %2014 = vmatmul.mubr.msk.f32.gmra.mxu1 %vm1151_vm10, %v2084_v21  ;;  %v804_v60 = vshll.u32 %v803_v58, 16  ;;  %v818_v30 = vshll.u32 %v817_v27, 16  ;;  %v831_v61 = vcvt.f32.s32 %v2827_v56  ;;  %v3095_v58 = vstv %s1616_s22  ;;  %v2052_v27 = vld [vmem:[%s3325_s1 + $0x8] sm:$0xff] }
 0x2a9   :  { %v665_v16 = vadd.s32 %v664_v4, %v662_v5  ;;  %v679_v42 = vadd.s32 %v678_v3, %v676_v31  ;;  %2016 = vmatprep.mubr.msk.f32.mxu1 %vm1152_vm11, %v2084_v21  ;;  %v845_v4 = vcvt.f32.s32 %v2829_v2  ;;  %v859_v31 = vcvt.f32.s32 %v2837_v13 }
 0x2aa   :  { %v689_v36 = vpop.xlane.xlu1 %688  ;;  %v703_v12 = vpop.xlane.xlu0 %702  ;;  %v832_v28 = vshll.u32 %v831_v61, 16 }
 0x2ab   :  { %958 = vst.msk [vmem:[%s3328_s6 + $0x58] sm:$0xff] %vm946_vm0, %v665_v16  ;;  %959 = vst.msk [vmem:[%s3328_s6 + $0x60] sm:$0xff] %vm946_vm0, %v679_v42  ;;  %v690_v14 = vcvt.f32.s32 %v689_v36  ;;  %v704_v38 = vcvt.f32.s32 %v703_v12  ;;  %vm1153_vm12 = vcmp.eq.s32.totalorder %v3365_v11, %v665_v16  ;;  %vm1154_vm13 = vcmp.eq.s32.totalorder %v3365_v11, %v679_v42 }
 0x2ac   :  { %2017 = vmatmul.mubr.msk.f32.gmra.mxu1 %vm1153_vm12, %v2084_v21  ;;  %v846_v5 = vshll.u32 %v845_v4, 16  ;;  %v873_v16 = vcvt.f32.s32 %v2839_v34  ;;  %v860_v22 = vshll.u32 %v859_v31, 16  ;;  %v887_v12 = vcvt.f32.s32 %v2847_v24 }
 0x2ad   :  { %v693_v51 = vadd.s32 %v692_v46, %v690_v14  ;;  %v707_v53 = vadd.s32 %v706_v0, %v704_v38  ;;  %2019 = vmatprep.mubr.msk.f32.mxu1 %vm1154_vm13, %v2084_v21  ;;  %v901_v14 = vcvt.f32.s32 %v2849_v35 }
 0x2ae   :  { %v717_v41 = vpop.xlane.xlu1 %716  ;;  %v731_v45 = vpop.xlane.xlu0 %730  ;;  %v874_v36 = vshll.u32 %v873_v16, 16 }
 0x2af   :  { %960 = vst.msk [vmem:[%s3328_s6 + $0x68] sm:$0xff] %vm946_vm0, %v693_v51  ;;  %961 = vst.msk [vmem:[%s3328_s6 + $0x70] sm:$0xff] %vm946_vm0, %v707_v53  ;;  %v718_v10 = vcvt.f32.s32 %v717_v41  ;;  %v732_v7 = vcvt.f32.s32 %v731_v45  ;;  %vm1155_vm14 = vcmp.eq.s32.totalorder %v3365_v11, %v693_v51  ;;  %vm1156_vm15 = vcmp.eq.s32.totalorder %v3365_v11, %v707_v53 }
 0x2b0   :  { %2020 = vmatmul.mubr.msk.f32.gmra.mxu1 %vm1155_vm14, %v2084_v21  ;;  %v902_v40 = vshll.u32 %v901_v14, 16  ;;  %v929_v41 = vcvt.f32.s32 %v2858_v32 }
 0x2b1   :  { %v721_v33 = vadd.s32 %v720_v15, %v718_v10  ;;  %v735_v50 = vadd.s32 %v734_v44, %v732_v7  ;;  %2022 = vmatprep.mubr.msk.f32.mxu1 %vm1156_vm15, %v2084_v21  ;;  %v888_v44 = vshll.u32 %v887_v12, 16  ;;  %v2057_v12 = vld [vmem:[%s3325_s1 + $0x20] sm:$0xff] }
 0x2b2   :  { %v745_v25 = vpop.xlane.xlu1 %744  ;;  %v759_v1 = vpop.xlane.xlu0 %758 }
 0x2b3   :  { %962 = vst.msk [vmem:[%s3328_s6 + $0x78] sm:$0xff] %vm946_vm0, %v721_v33  ;;  %963 = vst.msk [vmem:[%s3328_s6 + $0x80] sm:$0xff] %vm946_vm0, %v735_v50  ;;  %v746_v17 = vcvt.f32.s32 %v745_v25  ;;  %v760_v59 = vcvt.f32.s32 %v759_v1  ;;  %vm1157_vm1 = vcmp.eq.s32.totalorder %v3365_v11, %v721_v33  ;;  %vm1158_vm2 = vcmp.eq.s32.totalorder %v3365_v11, %v735_v50 }
 0x2b4   :  { %2023 = vmatmul.mubr.msk.f32.gmra.mxu1 %vm1157_vm1, %v2084_v21  ;;  %v916_v50 = vshll.u32 %v915_v18, 16 }
 0x2b5   :  { %v749_v63 = vadd.s32 %v748_v49, %v746_v17  ;;  %v763_v54 = vadd.s32 %v762_v9, %v760_v59  ;;  %2025 = vmatprep.mubr.msk.f32.mxu1 %vm1158_vm2, %v2084_v21  ;;  %v930_v49 = vshll.u32 %v929_v41, 16  ;;  %v943_v9 = vcvt.f32.s32 %v2864_v37 }
 0x2b6   :  { %v773_v6 = vpop.xlane.xlu1 %772  ;;  %v787_v8 = vpop.xlane.xlu0 %786 }
 0x2b7   :  { %964 = vst.msk [vmem:[%s3328_s6 + $0x88] sm:$0xff] %vm946_vm0, %v749_v63  ;;  %965 = vst.msk [vmem:[%s3328_s6 + $0x90] sm:$0xff] %vm946_vm0, %v763_v54  ;;  %v774_v39 = vcvt.f32.s32 %v773_v6  ;;  %v788_v20 = vcvt.f32.s32 %v787_v8  ;;  %vm1159_vm3 = vcmp.eq.s32.totalorder %v3365_v11, %v749_v63  ;;  %vm1160_vm4 = vcmp.eq.s32.totalorder %v3365_v11, %v763_v54 }
 0x2b8   :  { %2026 = vmatmul.mubr.msk.f32.gmra.mxu1 %vm1159_vm3, %v2084_v21  ;;  %v944_v63 = vshll.u32 %v943_v9, 16 }
 0x2b9   :  { %v777_v29 = vadd.s32 %v776_v23, %v774_v39  ;;  %v791_v62 = vadd.s32 %v790_v43, %v788_v20  ;;  %2028 = vmatprep.mubr.msk.f32.mxu1 %vm1160_vm4, %v2084_v21 }
 0x2ba   :  { %v801_v3 = vpop.xlane.xlu1 %800  ;;  %v815_v47 = vpop.xlane.xlu0 %814 }
 0x2bb   :  { %966 = vst.msk [vmem:[%s3328_s6 + $0x98] sm:$0xff] %vm946_vm0, %v777_v29  ;;  %967 = vst.msk [vmem:[%s3328_s6 + $0xa0] sm:$0xff] %vm946_vm0, %v791_v62  ;;  %v802_v57 = vcvt.f32.s32 %v801_v3  ;;  %v816_v19 = vcvt.f32.s32 %v815_v47  ;;  %vm1161_vm5 = vcmp.eq.s32.totalorder %v3365_v11, %v777_v29  ;;  %vm1162_vm6 = vcmp.eq.s32.totalorder %v3365_v11, %v791_v62 }
 0x2bc   :  { %2029 = vmatmul.mubr.msk.f32.gmra.mxu1 %vm1161_vm5, %v2084_v21 }
 0x2bd   :  { %v805_v56 = vadd.s32 %v804_v60, %v802_v57  ;;  %v819_v2 = vadd.s32 %v818_v30, %v816_v19  ;;  %2031 = vmatprep.mubr.msk.f32.mxu1 %vm1162_vm6, %v2084_v21  ;;  %v2054_v30 = vld [vmem:[%s3325_s1 + $0x18] sm:$0xff]  ;;  %v2055_v19 = vld [vmem:[%s3325_s1 + $0x10] sm:$0xff] }
 0x2be   :  { %v829_v42 = vpop.xlane.xlu1 %828  ;;  %v843_v46 = vpop.xlane.xlu0 %842 }
 0x2bf   :  { %968 = vst.msk [vmem:[%s3328_s6 + $0xa8] sm:$0xff] %vm946_vm0, %v805_v56  ;;  %969 = vst.msk [vmem:[%s3328_s6 + $0xb0] sm:$0xff] %vm946_vm0, %v819_v2  ;;  %v830_v0 = vcvt.f32.s32 %v829_v42  ;;  %v844_v48 = vcvt.f32.s32 %v843_v46  ;;  %vm1163_vm7 = vcmp.eq.s32.totalorder %v3365_v11, %v805_v56  ;;  %vm1164_vm8 = vcmp.eq.s32.totalorder %v3365_v11, %v819_v2  ;;  %v2056_v42 = vld [vmem:[%s3325_s1 + $0x28] sm:$0xff] }
 0x2c0   :  { %2032 = vmatmul.mubr.msk.f32.gmra.mxu1 %vm1163_vm7, %v2084_v21 }
 0x2c1   :  { %v833_v13 = vadd.s32 %v832_v28, %v830_v0  ;;  %v847_v34 = vadd.s32 %v846_v5, %v844_v48  ;;  %2034 = vmatprep.mubr.msk.f32.mxu1 %vm1164_vm8, %v2084_v21 }
 0x2c2   :  { %v857_v38 = vpop.xlane.xlu1 %856  ;;  %v871_v51 = vpop.xlane.xlu0 %870 }
 0x2c3   :  { %970 = vst.msk [vmem:[%s3328_s6 + $0xb8] sm:$0xff] %vm946_vm0, %v833_v13  ;;  %971 = vst.msk [vmem:[%s3328_s6 + $0xc0] sm:$0xff] %vm946_vm0, %v847_v34  ;;  %v858_v53 = vcvt.f32.s32 %v857_v38  ;;  %v872_v15 = vcvt.f32.s32 %v871_v51  ;;  %vm1165_vm9 = vcmp.eq.s32.totalorder %v3365_v11, %v833_v13  ;;  %vm1166_vm10 = vcmp.eq.s32.totalorder %v3365_v11, %v847_v34 }
 0x2c4   :  { %2035 = vmatmul.mubr.msk.f32.gmra.mxu1 %vm1165_vm9, %v2084_v21 }
 0x2c5   :  { %v861_v24 = vadd.s32 %v860_v22, %v858_v53  ;;  %v875_v35 = vadd.s32 %v874_v36, %v872_v15  ;;  %2037 = vmatprep.mubr.msk.f32.mxu1 %vm1166_vm10, %v2084_v21 }
 0x2c6   :  { %v885_v45 = vpop.xlane.xlu1 %884  ;;  %v899_v10 = vpop.xlane.xlu0 %898 }
 0x2c7   :  { %972 = vst.msk [vmem:[%s3328_s6 + $0xc8] sm:$0xff] %vm946_vm0, %v861_v24  ;;  %973 = vst.msk [vmem:[%s3328_s6 + $0xd0] sm:$0xff] %vm946_vm0, %v875_v35  ;;  %v886_v7 = vcvt.f32.s32 %v885_v45  ;;  %v900_v33 = vcvt.f32.s32 %v899_v10  ;;  %vm1167_vm11 = vcmp.eq.s32.totalorder %v3365_v11, %v861_v24  ;;  %vm1168_vm12 = vcmp.eq.s32.totalorder %v3365_v11, %v875_v35  ;;  %v2058_v24 = vld [vmem:[%s3325_s1 + $0x38] sm:$0xff] }
 0x2c8   :  { %2038 = vmatmul.mubr.msk.f32.gmra.mxu1 %vm1167_vm11, %v2084_v21 }
 0x2c9   :  { %v889_v26 = vadd.s32 %v888_v44, %v886_v7  ;;  %v903_v32 = vadd.s32 %v902_v40, %v900_v33  ;;  %2040 = vmatprep.mubr.msk.f32.mxu1 %vm1168_vm12, %v2084_v21  ;;  %v2059_v7 = vld [vmem:[%s3325_s1 + $0x30] sm:$0xff] }
 0x2ca   :  { %v913_v52 = vpop.xlane.xlu1 %912  ;;  %v927_v55 = vpop.xlane.xlu0 %926 }
 0x2cb   :  { %974 = vst.msk [vmem:[%s3328_s6 + $0xd8] sm:$0xff] %vm946_vm0, %v889_v26  ;;  %975 = vst.msk [vmem:[%s3328_s6 + $0xe0] sm:$0xff] %vm946_vm0, %v903_v32  ;;  %v914_v25 = vcvt.f32.s32 %v913_v52  ;;  %v928_v1 = vcvt.f32.s32 %v927_v55  ;;  %vm1169_vm13 = vcmp.eq.s32.totalorder %v3365_v11, %v889_v26  ;;  %vm1170_vm14 = vcmp.eq.s32.totalorder %v3365_v11, %v903_v32 }
 0x2cc   :  { %2041 = vmatmul.mubr.msk.f32.gmra.mxu1 %vm1169_vm13, %v2084_v21 }
 0x2cd   :  { %v917_v37 = vadd.s32 %v916_v50, %v914_v25  ;;  %v931_v17 = vadd.s32 %v930_v49, %v928_v1  ;;  %2043 = vmatprep.mubr.msk.f32.mxu1 %vm1170_vm14, %v2084_v21 }
 0x2ce   :  { %v941_v59 = vpop.xlane.xlu1 %940 }
 0x2cf   :  { %976 = vst.msk [vmem:[%s3328_s6 + $0xe8] sm:$0xff] %vm946_vm0, %v917_v37  ;;  %977 = vst.msk [vmem:[%s3328_s6 + $0xf0] sm:$0xff] %vm946_vm0, %v931_v17  ;;  %v942_v54 = vcvt.f32.s32 %v941_v59  ;;  %vm1171_vm15 = vcmp.eq.s32.totalorder %v3365_v11, %v917_v37  ;;  %vm1172_vm1 = vcmp.eq.s32.totalorder %v3365_v11, %v931_v17  ;;  %v2060_v37 = vld [vmem:[%s3325_s1 + $0x48] sm:$0xff] }
 0x2d0   :  { %2044 = vmatmul.mubr.msk.f32.gmra.mxu1 %vm1171_vm15, %v2084_v21 }
 0x2d1   :  { %v945_v23 = vadd.s32 %v944_v63, %v942_v54  ;;  %2046 = vmatprep.mubr.msk.f32.mxu1 %vm1172_vm1, %v2084_v21 }
 0x2d3   :  { %978 = vst.msk [vmem:[%s3328_s6 + $0xf8] sm:$0xff] %vm946_vm0, %v945_v23  ;;  %vm1173_vm2 = vcmp.eq.s32.totalorder %v3365_v11, %v945_v23  ;;  %v2053_v11 = vld [vmem:[%s3325_s1] sm:$0xff] }
 0x2d4   :  { %2047 = vmatmul.mubr.msk.f32.gmra.mxu1 %vm1173_vm2, %v2084_v21  ;;  %v2061_v23 = vld [vmem:[%s3325_s1 + $0x40] sm:$0xff] }
 0x358   :  { %v2003_v43 = vpop.f32.mrf.mxu1 }
 0x359   :  { %v1480_v6 = vsub.f32 %v2052_v27, %v2003_v43 }
 0x35a   :  { %v1320_v8 = vpop.f32.mrf.mxu1 }
 0x35b   :  { %v1512_v39 = vmul.f32 %v1480_v6, %v1480_v6  ;;  %v1619_v20 = vmul.f32 %v3095_v58, %v1480_v6  ;;  %v1479_v21 = vsub.f32 %v2053_v11, %v1320_v8 }
 0x35c   :  { %v2006_v29 = vpop.f32.mrf.mxu1 }
 0x35d   :  { %v1651_v62 = vsub.f32 %v2052_v27, %v1619_v20  ;;  %v1618_v60 = vmul.f32 %v3095_v58, %v1479_v21  ;;  %v1482_v61 = vsub.f32 %v2054_v30, %v2006_v29  ;;  %v1544_v3 = vmul.f32 0.0, %v1512_v39 }
 0x35e   :  { %v1330_v4 = vpop.f32.mrf.mxu1  ;;  %v1511_v47 = vmul.f32 %v1479_v21, %v1479_v21  ;;  %v2062_v21 = vld [vmem:[%s3325_s1 + $0x58] sm:$0xff] }
 0x35f   :  { %1683 = vst [vmem:[%s3330_s5 + $0x8] sm:$0xff] %v1651_v62  ;;  %v1650_v57 = vsub.f32 %v2053_v11, %v1618_v60  ;;  %v1481_v56 = vsub.f32 %v2055_v19, %v1330_v4  ;;  %v1621_v2 = vmul.f32 %v3095_v58, %v1482_v61  ;;  %v1514_v5 = vmul.f32 %v1482_v61, %v1482_v61 }
 0x360   :  { %v2009_v28 = vpop.f32.mrf.mxu1  ;;  %v1575_v13 = vadd.f32 %v1544_v3, %v1511_v47 }
 0x361   :  { %1682 = vst [vmem:[%s3330_s5] sm:$0xff] %v1650_v57  ;;  %v1513_v31 = vmul.f32 %v1481_v56, %v1481_v56  ;;  %v1620_v16 = vmul.f32 %v3095_v58, %v1481_v56  ;;  %v1484_v46 = vsub.f32 %v2056_v42, %v2009_v28  ;;  %v1653_v0 = vsub.f32 %v2054_v30, %v1621_v2 }
 0x362   :  { %v1340_v48 = vpop.f32.mrf.mxu1  ;;  %v1546_v51 = vmul.f32 0.0, %v1514_v5 }
 0x363   :  { %v1545_v34 = vmul.f32 0.0, %v1513_v31  ;;  %v1652_v22 = vsub.f32 %v2055_v19, %v1620_v16  ;;  %v1623_v36 = vmul.f32 %v3095_v58, %v1484_v46  ;;  %1685 = vst [vmem:[%s3330_s5 + $0x18] sm:$0xff] %v1653_v0  ;;  %v1483_v14 = vsub.f32 %v2057_v12, %v1340_v48  ;;  %v2063_v19 = vld [vmem:[%s3325_s1 + $0x50] sm:$0xff]  ;;  %v2064_v31 = vld [vmem:[%s3325_s1 + $0x68] sm:$0xff] }
 0x364   :  { %v2012_v38 = vpop.f32.mrf.mxu1  ;;  %v1516_v44 = vmul.f32 %v1484_v46, %v1484_v46 }
 0x365   :  { %v1576_v53 = vadd.f32 %v1575_v13, %v1545_v34  ;;  %1684 = vst [vmem:[%s3330_s5 + $0x10] sm:$0xff] %v1652_v22  ;;  %v1655_v15 = vsub.f32 %v2056_v42, %v1623_v36  ;;  %v1486_v35 = vsub.f32 %v2058_v24, %v2012_v38  ;;  %v1515_v40 = vmul.f32 %v1483_v14, %v1483_v14  ;;  %v2065_v22 = vld [vmem:[%s3325_s1 + $0x60] sm:$0xff] }
 0x366   :  { %v1622_v18 = vmul.f32 %v3095_v58, %v1483_v14  ;;  %v1350_v41 = vpop.f32.mrf.mxu1  ;;  %v1548_v55 = vmul.f32 0.0, %v1516_v44 }
 0x367   :  { %1687 = vst [vmem:[%s3330_s5 + $0x28] sm:$0xff] %v1655_v15  ;;  %v1577_v45 = vadd.f32 %v1576_v53, %v1546_v51  ;;  %v1625_v10 = vmul.f32 %v3095_v58, %v1486_v35  ;;  %v1485_v33 = vsub.f32 %v2059_v7, %v1350_v41  ;;  %v1547_v26 = vmul.f32 0.0, %v1515_v40 }
 0x368   :  { %v1654_v32 = vsub.f32 %v2057_v12, %v1622_v18  ;;  %v2015_v50 = vpop.f32.mrf.mxu1  ;;  %v1518_v1 = vmul.f32 %v1486_v35, %v1486_v35  ;;  %v2066_v18 = vld [vmem:[%s3325_s1 + $0x78] sm:$0xff] }
 0x369   :  { %v1657_v49 = vsub.f32 %v2058_v24, %v1625_v10  ;;  %v1517_v9 = vmul.f32 %v1485_v33, %v1485_v33  ;;  %v1624_v52 = vmul.f32 %v3095_v58, %v1485_v33  ;;  %v1578_v25 = vadd.f32 %v1577_v45, %v1547_v26  ;;  %v2067_v33 = vld [vmem:[%s3325_s1 + $0x70] sm:$0xff] }
 0x36a   :  { %1686 = vst [vmem:[%s3330_s5 + $0x20] sm:$0xff] %v1654_v32  ;;  %v1488_v17 = vsub.f32 %v2060_v37, %v2015_v50  ;;  %v1360_v59 = vpop.f32.mrf.mxu1  ;;  %v1550_v62 = vmul.f32 0.0, %v1518_v1 }
 0x36b   :  { %1689 = vst [vmem:[%s3330_s5 + $0x38] sm:$0xff] %v1657_v49  ;;  %v1549_v63 = vmul.f32 0.0, %v1517_v9  ;;  %v1656_v54 = vsub.f32 %v2059_v7, %v1624_v52  ;;  %v1487_v43 = vsub.f32 %v2061_v23, %v1360_v59  ;;  %v1579_v27 = vadd.f32 %v1578_v25, %v1548_v55  ;;  %v2068_v25 = vld [vmem:[%s3325_s1 + $0x88] sm:$0xff] }
 0x36c   :  { %v1627_v6 = vmul.f32 %v3095_v58, %v1488_v17  ;;  %v2018_v8 = vpop.f32.mrf.mxu1  ;;  %v1520_v39 = vmul.f32 %v1488_v17, %v1488_v17 }
 0x36d   :  { %1688 = vst [vmem:[%s3330_s5 + $0x30] sm:$0xff] %v1656_v54  ;;  %v1519_v20 = vmul.f32 %v1487_v43, %v1487_v43  ;;  %v1626_v11 = vmul.f32 %v3095_v58, %v1487_v43  ;;  %v1490_v29 = vsub.f32 %v2062_v21, %v2018_v8  ;;  %v1580_v60 = vadd.f32 %v1579_v27, %v1549_v63 }
 0x36e   :  { %v1659_v30 = vsub.f32 %v2060_v37, %v1627_v6  ;;  %v1370_v61 = vpop.f32.mrf.mxu1  ;;  %v1552_v28 = vmul.f32 0.0, %v1520_v39  ;;  %v2069_v6 = vld [vmem:[%s3325_s1 + $0x80] sm:$0xff] }
 0x36f   :  { %v1551_v4 = vmul.f32 0.0, %v1519_v20  ;;  %v1658_v3 = vsub.f32 %v2061_v23, %v1626_v11  ;;  %v1629_v47 = vmul.f32 %v3095_v58, %v1490_v29  ;;  %v1581_v57 = vadd.f32 %v1580_v60, %v1550_v62 }
 0x370   :  { %1691 = vst [vmem:[%s3330_s5 + $0x48] sm:$0xff] %v1659_v30  ;;  %v1489_v56 = vsub.f32 %v2063_v19, %v1370_v61  ;;  %v2021_v2 = vpop.f32.mrf.mxu1  ;;  %v1522_v46 = vmul.f32 %v1490_v29, %v1490_v29 }
 0x371   :  { %1690 = vst [vmem:[%s3330_s5 + $0x40] sm:$0xff] %v1658_v3  ;;  %v1661_v5 = vsub.f32 %v2062_v21, %v1629_v47  ;;  %v1492_v16 = vsub.f32 %v2064_v31, %v2021_v2  ;;  %v1582_v42 = vadd.f32 %v1581_v57, %v1551_v4  ;;  %v2070_v21 = vld [vmem:[%s3325_s1 + $0x98] sm:$0xff]  ;;  %v2071_v47 = vld [vmem:[%s3325_s1 + $0x90] sm:$0xff] }
 0x372   :  { %v1521_v0 = vmul.f32 %v1489_v56, %v1489_v56  ;;  %v1628_v48 = vmul.f32 %v3095_v58, %v1489_v56  ;;  %v1380_v13 = vpop.f32.mrf.mxu1  ;;  %v1554_v35 = vmul.f32 0.0, %v1522_v46 }
 0x373   :  { %1693 = vst [vmem:[%s3330_s5 + $0x58] sm:$0xff] %v1661_v5  ;;  %v1631_v34 = vmul.f32 %v3095_v58, %v1492_v16  ;;  %v1491_v36 = vsub.f32 %v2065_v22, %v1380_v13  ;;  %v1583_v14 = vadd.f32 %v1582_v42, %v1552_v28  ;;  %v1524_v40 = vmul.f32 %v1492_v16, %v1492_v16 }
 0x374   :  { %v1553_v12 = vmul.f32 0.0, %v1521_v0  ;;  %v1660_v38 = vsub.f32 %v2063_v19, %v1628_v48  ;;  %v2024_v51 = vpop.f32.mrf.mxu1  ;;  %v2072_v48 = vld [vmem:[%s3325_s1 + $0xa8] sm:$0xff] }
 0x375   :  { %v1663_v53 = vsub.f32 %v2064_v31, %v1631_v34  ;;  %v1523_v15 = vmul.f32 %v1491_v36, %v1491_v36  ;;  %v1630_v24 = vmul.f32 %v3095_v58, %v1491_v36  ;;  %v1494_v41 = vsub.f32 %v2066_v18, %v2024_v51 }
 0x376   :  { %v1584_v44 = vadd.f32 %v1583_v14, %v1553_v12  ;;  %1692 = vst [vmem:[%s3330_s5 + $0x50] sm:$0xff] %v1660_v38  ;;  %v1390_v45 = vpop.f32.mrf.mxu1  ;;  %v1556_v37 = vmul.f32 0.0, %v1524_v40  ;;  %v2073_v12 = vld [vmem:[%s3325_s1 + $0xa0] sm:$0xff] }
 0x377   :  { %1695 = vst [vmem:[%s3330_s5 + $0x68] sm:$0xff] %v1663_v53  ;;  %v1555_v10 = vmul.f32 0.0, %v1523_v15  ;;  %v1662_v7 = vsub.f32 %v2065_v22, %v1630_v24  ;;  %v1493_v26 = vsub.f32 %v2067_v33, %v1390_v45  ;;  %v1633_v50 = vmul.f32 %v3095_v58, %v1494_v41 }
 0x378   :  { %v1585_v32 = vadd.f32 %v1584_v44, %v1554_v35  ;;  %v2027_v49 = vpop.f32.mrf.mxu1  ;;  %v1526_v9 = vmul.f32 %v1494_v41, %v1494_v41  ;;  %v2074_v44 = vld [vmem:[%s3325_s1 + $0xb8] sm:$0xff] }
 0x379   :  { %1694 = vst [vmem:[%s3330_s5 + $0x60] sm:$0xff] %v1662_v7  ;;  %v1525_v52 = vmul.f32 %v1493_v26, %v1493_v26  ;;  %v1632_v55 = vmul.f32 %v3095_v58, %v1493_v26  ;;  %v1496_v1 = vsub.f32 %v2068_v25, %v2027_v49  ;;  %v1665_v59 = vsub.f32 %v2066_v18, %v1633_v50  ;;  %v2075_v50 = vld [vmem:[%s3325_s1 + $0xb0] sm:$0xff] }
 0x37a   :  { %v1586_v17 = vadd.f32 %v1585_v32, %v1555_v10  ;;  %v1400_v63 = vpop.f32.mrf.mxu1  ;;  %v1558_v20 = vmul.f32 0.0, %v1526_v9 }
 0x37b   :  { %v1557_v54 = vmul.f32 0.0, %v1525_v52  ;;  %v1664_v23 = vsub.f32 %v2067_v33, %v1632_v55  ;;  %v1635_v43 = vmul.f32 %v3095_v58, %v1496_v1  ;;  %1697 = vst [vmem:[%s3330_s5 + $0x78] sm:$0xff] %v1665_v59  ;;  %v1495_v8 = vsub.f32 %v2069_v6, %v1400_v63 }
 0x37c   :  { %v1587_v27 = vadd.f32 %v1586_v17, %v1556_v37  ;;  %v2030_v39 = vpop.f32.mrf.mxu1  ;;  %v1528_v60 = vmul.f32 %v1496_v1, %v1496_v1 }
 0x37d   :  { %1696 = vst [vmem:[%s3330_s5 + $0x70] sm:$0xff] %v1664_v23  ;;  %v1667_v11 = vsub.f32 %v2068_v25, %v1635_v43  ;;  %v1498_v29 = vsub.f32 %v2070_v21, %v2030_v39  ;;  %v1527_v30 = vmul.f32 %v1495_v8, %v1495_v8  ;;  %v1634_v61 = vmul.f32 %v3095_v58, %v1495_v8  ;;  %v2076_v25 = vld [vmem:[%s3325_s1 + $0xc8] sm:$0xff]  ;;  %v2077_v43 = vld [vmem:[%s3325_s1 + $0xc0] sm:$0xff] }
 0x37e   :  { %v1588_v62 = vadd.f32 %v1587_v27, %v1557_v54  ;;  %v1410_v4 = vpop.f32.mrf.mxu1  ;;  %v1560_v42 = vmul.f32 0.0, %v1528_v60 }
 0x37f   :  { %1699 = vst [vmem:[%s3330_s5 + $0x88] sm:$0xff] %v1667_v11  ;;  %v1637_v3 = vmul.f32 %v3095_v58, %v1498_v29  ;;  %v1497_v57 = vsub.f32 %v2071_v47, %v1410_v4  ;;  %v1559_v19 = vmul.f32 0.0, %v1527_v30  ;;  %v1666_v2 = vsub.f32 %v2069_v6, %v1634_v61  ;;  %v2078_v61 = vld [vmem:[%s3325_s1 + $0xd8] sm:$0xff] }
 0x380   :  { %v1589_v56 = vadd.f32 %v1588_v62, %v1558_v20  ;;  %v2033_v28 = vpop.f32.mrf.mxu1  ;;  %v1530_v0 = vmul.f32 %v1498_v29, %v1498_v29 }
 0x381   :  { %v1669_v5 = vsub.f32 %v2070_v21, %v1637_v3  ;;  %v1529_v31 = vmul.f32 %v1497_v57, %v1497_v57  ;;  %v1636_v16 = vmul.f32 %v3095_v58, %v1497_v57  ;;  %1698 = vst [vmem:[%s3330_s5 + $0x80] sm:$0xff] %v1666_v2  ;;  %v1500_v13 = vsub.f32 %v2072_v48, %v2033_v28 }
 0x382   :  { %v1590_v46 = vadd.f32 %v1589_v56, %v1559_v19  ;;  %v1420_v34 = vpop.f32.mrf.mxu1  ;;  %v1562_v18 = vmul.f32 0.0, %v1530_v0  ;;  %v2079_v19 = vld [vmem:[%s3325_s1 + $0xd0] sm:$0xff] }
 0x383   :  { %1701 = vst [vmem:[%s3330_s5 + $0x98] sm:$0xff] %v1669_v5  ;;  %v1561_v22 = vmul.f32 0.0, %v1529_v31  ;;  %v1668_v36 = vsub.f32 %v2071_v47, %v1636_v16  ;;  %v1499_v14 = vsub.f32 %v2073_v12, %v1420_v34  ;;  %v1639_v51 = vmul.f32 %v3095_v58, %v1500_v13 }
 0x384   :  { %v1591_v38 = vadd.f32 %v1590_v46, %v1560_v42  ;;  %v2036_v53 = vpop.f32.mrf.mxu1  ;;  %v1532_v15 = vmul.f32 %v1500_v13, %v1500_v13  ;;  %v2080_v46 = vld [vmem:[%s3325_s1 + $0xe8] sm:$0xff] }
 0x385   :  { %1700 = vst [vmem:[%s3330_s5 + $0x90] sm:$0xff] %v1668_v36  ;;  %v1531_v24 = vmul.f32 %v1499_v14, %v1499_v14  ;;  %v1638_v35 = vmul.f32 %v3095_v58, %v1499_v14  ;;  %v1502_v40 = vsub.f32 %v2074_v44, %v2036_v53  ;;  %v1671_v45 = vsub.f32 %v2072_v48, %v1639_v51  ;;  %v2081_v51 = vld [vmem:[%s3325_s1 + $0xe0] sm:$0xff] }
 0x386   :  { %v1592_v41 = vadd.f32 %v1591_v38, %v1561_v22  ;;  %v1430_v10 = vpop.f32.mrf.mxu1  ;;  %v1564_v52 = vmul.f32 0.0, %v1532_v15 }
 0x387   :  { %v1563_v7 = vmul.f32 0.0, %v1531_v24  ;;  %v1670_v33 = vsub.f32 %v2073_v12, %v1638_v35  ;;  %v1641_v26 = vmul.f32 %v3095_v58, %v1502_v40  ;;  %1703 = vst [vmem:[%s3330_s5 + $0xa8] sm:$0xff] %v1671_v45  ;;  %v1501_v49 = vsub.f32 %v2075_v50, %v1430_v10 }
 0x388   :  { %v1593_v32 = vadd.f32 %v1592_v41, %v1562_v18  ;;  %v2039_v9 = vpop.f32.mrf.mxu1  ;;  %v1534_v17 = vmul.f32 %v1502_v40, %v1502_v40 }
 0x389   :  { %1702 = vst [vmem:[%s3330_s5 + $0xa0] sm:$0xff] %v1670_v33  ;;  %v1673_v55 = vsub.f32 %v2074_v44, %v1641_v26  ;;  %v1504_v1 = vsub.f32 %v2076_v25, %v2039_v9  ;;  %v1533_v59 = vmul.f32 %v1501_v49, %v1501_v49  ;;  %v1640_v63 = vmul.f32 %v3095_v58, %v1501_v49  ;;  %v2082_v44 = vld [vmem:[%s3325_s1 + $0xf8] sm:$0xff]  ;;  %v2083_v26 = vld [vmem:[%s3325_s1 + $0xf0] sm:$0xff] }
 0x38a   :  { %v1594_v37 = vadd.f32 %v1593_v32, %v1563_v7  ;;  %v1440_v54 = vpop.f32.mrf.mxu1  ;;  %v1566_v62 = vmul.f32 0.0, %v1534_v17 }
 0x38b   :  { %1705 = vst [vmem:[%s3330_s5 + $0xb8] sm:$0xff] %v1673_v55  ;;  %v1643_v23 = vmul.f32 %v3095_v58, %v1504_v1  ;;  %v1503_v27 = vsub.f32 %v2077_v43, %v1440_v54  ;;  %v1565_v6 = vmul.f32 0.0, %v1533_v59  ;;  %v1672_v39 = vsub.f32 %v2075_v50, %v1640_v63 }
 0x38c   :  { %v1595_v8 = vadd.f32 %v1594_v37, %v1564_v52  ;;  %v2042_v20 = vpop.f32.mrf.mxu1  ;;  %v1536_v30 = vmul.f32 %v1504_v1, %v1504_v1 }
 0x38d   :  { %v1675_v11 = vsub.f32 %v2076_v25, %v1643_v23  ;;  %v1535_v21 = vmul.f32 %v1503_v27, %v1503_v27  ;;  %v1642_v29 = vmul.f32 %v3095_v58, %v1503_v27  ;;  %1704 = vst [vmem:[%s3330_s5 + $0xb0] sm:$0xff] %v1672_v39  ;;  %v1506_v4 = vsub.f32 %v2078_v61, %v2042_v20 }
 0x38e   :  { %v1596_v60 = vadd.f32 %v1595_v8, %v1565_v6  ;;  %v1450_v3 = vpop.f32.mrf.mxu1  ;;  %v1568_v48 = vmul.f32 0.0, %v1536_v30 }
 0x38f   :  { %1707 = vst [vmem:[%s3330_s5 + $0xc8] sm:$0xff] %v1675_v11  ;;  %v1567_v47 = vmul.f32 0.0, %v1535_v21  ;;  %v1674_v57 = vsub.f32 %v2077_v43, %v1642_v29  ;;  %v1505_v56 = vsub.f32 %v2079_v19, %v1450_v3  ;;  %v1645_v28 = vmul.f32 %v3095_v58, %v1506_v4 }
 0x390   :  { %v1597_v2 = vadd.f32 %v1596_v60, %v1566_v62  ;;  %v2045_v5 = vpop.f32.mrf.mxu1  ;;  %v1538_v31 = vmul.f32 %v1506_v4, %v1506_v4 }
 0x391   :  { %1706 = vst [vmem:[%s3330_s5 + $0xc0] sm:$0xff] %v1674_v57  ;;  %v1537_v16 = vmul.f32 %v1505_v56, %v1505_v56  ;;  %v1644_v42 = vmul.f32 %v3095_v58, %v1505_v56  ;;  %v1508_v0 = vsub.f32 %v2080_v46, %v2045_v5  ;;  %v1677_v34 = vsub.f32 %v2078_v61, %v1645_v28 }
 0x392   :  { %v1598_v13 = vadd.f32 %v1597_v2, %v1567_v47  ;;  %v1460_v22 = vpop.f32.mrf.mxu1  ;;  %v1570_v24 = vmul.f32 0.0, %v1538_v31 }
 0x393   :  { %v1569_v36 = vmul.f32 0.0, %v1537_v16  ;;  %v1676_v12 = vsub.f32 %v2079_v19, %v1644_v42  ;;  %v1647_v14 = vmul.f32 %v3095_v58, %v1508_v0  ;;  %1709 = vst [vmem:[%s3330_s5 + $0xd8] sm:$0xff] %v1677_v34  ;;  %v1507_v53 = vsub.f32 %v2081_v51, %v1460_v22 }
 0x394   :  { %v1599_v38 = vadd.f32 %v1598_v13, %v1568_v48  ;;  %v2048_v15 = vpop.f32.mrf.mxu1  ;;  %v1540_v41 = vmul.f32 %v1508_v0, %v1508_v0 }
 0x395   :  { %1708 = vst [vmem:[%s3330_s5 + $0xd0] sm:$0xff] %v1676_v12  ;;  %v1679_v35 = vsub.f32 %v2080_v46, %v1647_v14  ;;  %v1510_v40 = vsub.f32 %v2082_v44, %v2048_v15  ;;  %v1539_v45 = vmul.f32 %v1507_v53, %v1507_v53  ;;  %v1646_v10 = vmul.f32 %v3095_v58, %v1507_v53 }
 0x396   :  { %v1600_v18 = vadd.f32 %v1599_v38, %v1569_v36  ;;  %v1470_v7 = vpop.f32.mrf.mxu1  ;;  %v1572_v1 = vmul.f32 0.0, %v1540_v41 }
 0x397   :  { %1711 = vst [vmem:[%s3330_s5 + $0xe8] sm:$0xff] %v1679_v35  ;;  %v1649_v33 = vmul.f32 %v3095_v58, %v1510_v40  ;;  %v1509_v32 = vsub.f32 %v2083_v26, %v1470_v7  ;;  %v1571_v50 = vmul.f32 0.0, %v1539_v45  ;;  %v1678_v9 = vsub.f32 %v2081_v51, %v1646_v10 }
 0x398   :  { %v1601_v49 = vadd.f32 %v1600_v18, %v1570_v24  ;;  %v1542_v17 = vmul.f32 %v1510_v40, %v1510_v40 }
 0x399   :  { %v1681_v52 = vsub.f32 %v2082_v44, %v1649_v33  ;;  %v1541_v55 = vmul.f32 %v1509_v32, %v1509_v32  ;;  %v1648_v25 = vmul.f32 %v3095_v58, %v1509_v32  ;;  %1710 = vst [vmem:[%s3330_s5 + $0xe0] sm:$0xff] %v1678_v9 }
 0x39a   :  { %v1602_v37 = vadd.f32 %v1601_v49, %v1571_v50  ;;  %v1574_v23 = vmul.f32 0.0, %v1542_v17 }
 0x39b   :  { %1713 = vst [vmem:[%s3330_s5 + $0xf8] sm:$0xff] %v1681_v52  ;;  %v1573_v59 = vmul.f32 0.0, %v1541_v55  ;;  %v1680_v63 = vsub.f32 %v2083_v26, %v1648_v25 }
 0x39c   :  { %v1603_v54 = vadd.f32 %v1602_v37, %v1572_v1 }
 0x39d   :  { %1712 = vst [vmem:[%s3330_s5 + $0xf0] sm:$0xff] %v1680_v63 }
 0x39e   :  { %v1604_v58 = vadd.f32 %v1603_v54, %v1573_v59 }
 0x3a0   :  { %v1605_v43 = vadd.f32 %v1604_v58, %v1574_v23 }
 0x3a2   :  { %1606 = vadd.xlane.f32.xlu0 %v1605_v43 }
 0x42b   :  { %v1607_v27 = vpop.xlane.xlu0 %1606 }
 0x42c   :  { %v1608_v6 = vrot.slane %v1607_v27, 4 }
 0x42e   :  { %v1609_v8 = vadd.f32 %v1608_v6, %v1607_v27 }
 0x430   :  { %v1610_v39 = vrot.slane %v1609_v8, 2 }
 0x432   :  { %v1611_v20 = vadd.f32 %v1610_v39, %v1609_v8 }
 0x434   :  { %v1612_v11 = vrot.slane %v1611_v20, 1 }
 0x436   :  { %v1613_v21 = vadd.f32 %v1612_v11, %v1611_v20 }
 0x438   :  { %2049 = vpush %v1613_v21 }
 0x469   :  { %s2050_s11 = spop %2049 }
 0x46a   :  { %v1714_v29 = vstv %s2050_s11 }
 0x46b   :  { %1715 = vst [vmem:[%s3331_s7] sm:$0x1] %v1714_v29 }

</bundles_post_ra>
